<compile_context>
chip_gen: v7x
topology: tpu7x:2x2x1
jax: 0.10.0
libtpu: 0.0.40
codegen_flags: <defaults>
</compile_context>

<pallas_src>
import jax
import jax.numpy as jnp
from jax.experimental import pallas as pl
from jax.experimental.pallas import tpu as pltpu

# ---- Critic dimensions (mirrors Critic(n_agent, dim_observation, dim_action)) ----
N_AGENT = 2
DIM_OBSERVATION = 16
DIM_ACTION = 5
OBS_DIM = DIM_OBSERVATION * N_AGENT      # 32
ACT_DIM = DIM_ACTION * N_AGENT           # 10
ACT_DIM_PAD = 16                         # pad action features to a sublane multiple
OUT_PAD = 128                            # lane-dense FC5 output; column 0 is the real Q

H1, H2, H3, H4 = 1024, 512, 256, 128


def _round_up(x, m):
    return (x + m - 1) // m * m


def _choose_tile(batch):
    """Batch tile: fill the MXU (256 rows on v6e/v7x), keep grid >= 2 for v7x megacore."""
    b8 = _round_up(batch, 8)
    tile = min(256, b8)
    if batch > 64:
        tile = min(tile, _round_up((b8 + 1) // 2, 8))
    return tile


def critic_kernel(obs_ref, act_ref,
                  w1_ref, b1_ref,
                  w2a_ref, w2b_ref, b2_ref,
                  w3_ref, b3_ref,
                  w4_ref, b4_ref,
                  w5_ref, b5_ref,
                  out_ref):
    """One batch tile of the 5-layer critic MLP, fully resident in VMEM."""

    def mm(x_bf16, w_ref):
        # bf16 x bf16 -> f32 accumulation on the MXU.
        return jnp.dot(x_bf16, w_ref[...], preferred_element_type=jnp.float32)

    obs = obs_ref[...].astype(jnp.bfloat16)
    act = act_ref[...].astype(jnp.bfloat16)

    # bias-add / ReLU in f32, then a single cast to bf16 per layer (half-width VMEM
    # intermediates; same quantization point the MXU would have imposed anyway).
    h = jnp.maximum(mm(obs, w1_ref) + b1_ref[...], 0.0).astype(jnp.bfloat16)
    # torch.cat([h, acts], 1) @ W2  ==  h @ W2[:H1] + acts @ W2[H1:]
    h = jnp.maximum(mm(h, w2a_ref) + mm(act, w2b_ref) + b2_ref[...], 0.0
                    ).astype(jnp.bfloat16)
    h = jnp.maximum(mm(h, w3_ref) + b3_ref[...], 0.0).astype(jnp.bfloat16)
    h = jnp.maximum(mm(h, w4_ref) + b4_ref[...], 0.0).astype(jnp.bfloat16)
    # Lane-dense (tile_b, 128) output; padded columns of W5/b5 are exactly zero.
    out_ref[...] = mm(h, w5_ref) + b5_ref[...]


def make_critic_params(key):
    """PyTorch nn.Linear-style init; weights stored as (in_features, out_features), f32."""
    dims_in = [OBS_DIM, H1 + ACT_DIM, H2, H3, H4]
    dims_out = [H1, H2, H3, H4, 1]
    params = []
    for fan_in, fan_out in zip(dims_in, dims_out):
        key, kw, kb = jax.random.split(key, 3)
        bound = 1.0 / jnp.sqrt(fan_in)
        w = jax.random.uniform(kw, (fan_in, fan_out), jnp.float32, -bound, bound)
        b = jax.random.uniform(kb, (1, fan_out), jnp.float32, -bound, bound)
        params.append((w, b))
    return params


def prepare_params(params):
    """Split W2 (concat fold), pad action rows, pad FC5 to 128 lanes, cast weights bf16."""
    (w1, b1), (w2, b2), (w3, b3), (w4, b4), (w5, b5) = params
    w2a = w2[:H1]
    w2b = jnp.zeros((ACT_DIM_PAD, H2), jnp.float32).at[:ACT_DIM].set(w2[H1:])
    w5p = jnp.zeros((H4, OUT_PAD), jnp.float32).at[:, :1].set(w5)
    b5p = jnp.zeros((1, OUT_PAD), jnp.float32).at[:, :1].set(b5)
    bf = lambda w: w.astype(jnp.bfloat16)
    return (bf(w1), b1, bf(w2a), bf(w2b), b2, bf(w3), b3, bf(w4), b4, bf(w5p), b5p)


@jax.jit
def critic_forward(obs, acts, prepped):
    batch = obs.shape[0]
    tile_b = _choose_tile(batch)
    padded = _round_up(batch, tile_b)

    obs_p = jnp.zeros((padded, OBS_DIM), jnp.float32).at[:batch].set(obs)
    acts_p = jnp.zeros((padded, ACT_DIM_PAD), jnp.float32).at[:batch, :ACT_DIM].set(acts)

    w1, b1, w2a, w2b, b2, w3, b3, w4, b4, w5, b5 = prepped

    def row_map(i):
        return (i, 0)

    def pinned(i):           # constant block index -> weights stay VMEM-resident
        return (0, 0)

    full = lambda a: pl.BlockSpec(a.shape, pinned)

    in_specs = [
        pl.BlockSpec((tile_b, OBS_DIM), row_map),
        pl.BlockSpec((tile_b, ACT_DIM_PAD), row_map),
        full(w1), full(b1),
        full(w2a), full(w2b), full(b2),
        full(w3), full(b3),
        full(w4), full(b4),
        full(w5), full(b5),
    ]

    flops = 2 * padded * (OBS_DIM * H1 + H1 * H2 + ACT_DIM_PAD * H2
                          + H2 * H3 + H3 * H4 + H4 * OUT_PAD)
    weight_bytes = sum(int(a.size) * a.dtype.itemsize
                       for a in (w1, b1, w2a, w2b, b2, w3, b3, w4, b4, w5, b5))
    io_bytes = int(obs_p.size) * 4 + int(acts_p.size) * 4 + padded * OUT_PAD * 4
    cost = pl.CostEstimate(flops=flops, transcendentals=0,
                           bytes_accessed=weight_bytes + io_bytes)

    out = pl.pallas_call(
        critic_kernel,
        out_shape=jax.ShapeDtypeStruct((padded, OUT_PAD), jnp.float32),
        grid=(padded // tile_b,),
        in_specs=in_specs,
        out_specs=pl.BlockSpec((tile_b, OUT_PAD), row_map),
        compiler_params=pltpu.CompilerParams(
            dimension_semantics=("parallel",),
            vmem_limit_bytes=32 << 20),
        cost_estimate=cost,
    )(obs_p, acts_p, *prepped)
    # only column 0 carries the real Q value; padded rows/columns are sliced off
    return out[:batch, :1]


def critic_forward_ref(obs, acts, params):
    """Pure-JAX reference with the original (f32, concat-based) semantics."""
    (w1, b1), (w2, b2), (w3, b3), (w4, b4), (w5, b5) = params
    h = jax.nn.relu(obs @ w1 + b1)
    h = jnp.concatenate([h, acts], axis=1)
    h = jax.nn.relu(h @ w2 + b2)
    h = jax.nn.relu(h @ w3 + b3)
    h = jax.nn.relu(h @ w4 + b4)
    return h @ w5 + b5


if __name__ == "__main__":
    key = jax.random.PRNGKey(0)
    key, ko, ka, kp = jax.random.split(key, 4)

    batch = 8
    obs = jax.random.normal(ko, (batch, OBS_DIM), dtype=jnp.float32)
    acts = jax.random.normal(ka, (batch, ACT_DIM), dtype=jnp.float32)

    params = make_critic_params(kp)
    prepped = prepare_params(params)

    out = critic_forward(obs, acts, prepped)
    out = jax.block_until_ready(out)

    ref = critic_forward_ref(obs, acts, params)
    assert out.shape == (batch, 1)
    # bf16 weights / bf16 activation path inside the kernel -> loosened tolerance vs f32 ref.
    assert jnp.allclose(out, ref, atol=2e-2, rtol=2e-2), (
        f"mismatch vs reference, max abs err {float(jnp.max(jnp.abs(out - ref)))}")

    print("KERNEL_OK")
</pallas_src>

<mosaic_0001>
module attributes {stable_mosaic.version = 11 : i64} {
  func.func @critic_kernel(%arg0: i32, %arg1: memref<8x32xf32, #tpu.memory_space<vmem>>, %arg2: memref<8x16xf32, #tpu.memory_space<vmem>>, %arg3: memref<32x1024xbf16, #tpu.memory_space<vmem>>, %arg4: memref<1x1024xf32, #tpu.memory_space<vmem>>, %arg5: memref<1024x512xbf16, #tpu.memory_space<vmem>>, %arg6: memref<16x512xbf16, #tpu.memory_space<vmem>>, %arg7: memref<1x512xf32, #tpu.memory_space<vmem>>, %arg8: memref<512x256xbf16, #tpu.memory_space<vmem>>, %arg9: memref<1x256xf32, #tpu.memory_space<vmem>>, %arg10: memref<256x128xbf16, #tpu.memory_space<vmem>>, %arg11: memref<1x128xf32, #tpu.memory_space<vmem>>, %arg12: memref<128x128xbf16, #tpu.memory_space<vmem>>, %arg13: memref<1x128xf32, #tpu.memory_space<vmem>>, %arg14: memref<8x128xf32, #tpu.memory_space<vmem>>) attributes {dimension_semantics = [#tpu.dimension_semantics<parallel>], iteration_bounds = array<i64: 1>, scalar_prefetch = 0 : i64, scratch_operands = 0 : i64, tpu.core_type = #tpu.core_type<tc>, window_params = [{transform_indices = @transform_0, window_bounds = array<i64: 8, 32>}, {transform_indices = @transform_1, window_bounds = array<i64: 8, 16>}, {pipeline_mode = #tpu.pipeline_mode<synchronous>, transform_indices = @transform_2, window_bounds = array<i64: 32, 1024>}, {pipeline_mode = #tpu.pipeline_mode<synchronous>, transform_indices = @transform_3, window_bounds = array<i64: 1, 1024>}, {pipeline_mode = #tpu.pipeline_mode<synchronous>, transform_indices = @transform_4, window_bounds = array<i64: 1024, 512>}, {pipeline_mode = #tpu.pipeline_mode<synchronous>, transform_indices = @transform_5, window_bounds = array<i64: 16, 512>}, {pipeline_mode = #tpu.pipeline_mode<synchronous>, transform_indices = @transform_6, window_bounds = array<i64: 1, 512>}, {pipeline_mode = #tpu.pipeline_mode<synchronous>, transform_indices = @transform_7, window_bounds = array<i64: 512, 256>}, {pipeline_mode = #tpu.pipeline_mode<synchronous>, transform_indices = @transform_8, window_bounds = array<i64: 1, 256>}, {pipeline_mode = #tpu.pipeline_mode<synchronous>, transform_indices = @transform_9, window_bounds = array<i64: 256, 128>}, {pipeline_mode = #tpu.pipeline_mode<synchronous>, transform_indices = @transform_10, window_bounds = array<i64: 1, 128>}, {pipeline_mode = #tpu.pipeline_mode<synchronous>, transform_indices = @transform_11, window_bounds = array<i64: 128, 128>}, {pipeline_mode = #tpu.pipeline_mode<synchronous>, transform_indices = @transform_12, window_bounds = array<i64: 1, 128>}, {transform_indices = @transform_13, window_bounds = array<i64: 8, 128>}]} {
    %c0 = arith.constant 0 : index
    %c0_0 = arith.constant 0 : index
    %0 = vector.load %arg1[%c0, %c0_0] : memref<8x32xf32, #tpu.memory_space<vmem>>, vector<8x32xf32>
    %1 = arith.truncf %0 : vector<8x32xf32> to vector<8x32xbf16>
    %c0_1 = arith.constant 0 : index
    %c0_2 = arith.constant 0 : index
    %2 = vector.load %arg2[%c0_1, %c0_2] : memref<8x16xf32, #tpu.memory_space<vmem>>, vector<8x16xf32>
    %3 = arith.truncf %2 : vector<8x16xf32> to vector<8x16xbf16>
    %c0_3 = arith.constant 0 : index
    %c0_4 = arith.constant 0 : index
    %4 = vector.load %arg3[%c0_3, %c0_4] : memref<32x1024xbf16, #tpu.memory_space<vmem>>, vector<32x1024xbf16>
    %cst = arith.constant dense<0.000000e+00> : vector<8x1024xf32>
    %5 = tpu.matmul %1, %4, %cst {dimension_numbers = #tpu.dot_dimension_numbers<[1], [0], [0], [1], [0, 0, 1, 1], [], []>} : vector<8x32xbf16>, vector<32x1024xbf16>, vector<8x1024xf32> -> vector<8x1024xf32>
    %c0_5 = arith.constant 0 : index
    %c0_6 = arith.constant 0 : index
    %6 = vector.load %arg4[%c0_5, %c0_6] : memref<1x1024xf32, #tpu.memory_space<vmem>>, vector<1x1024xf32>
    %7 = vector.broadcast %6 : vector<1x1024xf32> to vector<8x1024xf32>
    %8 = arith.addf %5, %7 : vector<8x1024xf32>
    %cst_7 = arith.constant 0.000000e+00 : f32
    %9 = vector.broadcast %cst_7 : f32 to vector<8x1024xf32>
    %10 = arith.maximumf %8, %9 : vector<8x1024xf32>
    %11 = arith.truncf %10 : vector<8x1024xf32> to vector<8x1024xbf16>
    %c0_8 = arith.constant 0 : index
    %c0_9 = arith.constant 0 : index
    %12 = vector.load %arg5[%c0_8, %c0_9] : memref<1024x512xbf16, #tpu.memory_space<vmem>>, vector<1024x512xbf16>
    %cst_10 = arith.constant dense<0.000000e+00> : vector<8x512xf32>
    %13 = tpu.matmul %11, %12, %cst_10 {dimension_numbers = #tpu.dot_dimension_numbers<[1], [0], [0], [1], [0, 0, 1, 1], [], []>} : vector<8x1024xbf16>, vector<1024x512xbf16>, vector<8x512xf32> -> vector<8x512xf32>
    %c0_11 = arith.constant 0 : index
    %c0_12 = arith.constant 0 : index
    %14 = vector.load %arg6[%c0_11, %c0_12] : memref<16x512xbf16, #tpu.memory_space<vmem>>, vector<16x512xbf16>
    %cst_13 = arith.constant dense<0.000000e+00> : vector<8x512xf32>
    %15 = tpu.matmul %3, %14, %cst_13 {dimension_numbers = #tpu.dot_dimension_numbers<[1], [0], [0], [1], [0, 0, 1, 1], [], []>} : vector<8x16xbf16>, vector<16x512xbf16>, vector<8x512xf32> -> vector<8x512xf32>
    %16 = arith.addf %13, %15 : vector<8x512xf32>
    %c0_14 = arith.constant 0 : index
    %c0_15 = arith.constant 0 : index
    %17 = vector.load %arg7[%c0_14, %c0_15] : memref<1x512xf32, #tpu.memory_space<vmem>>, vector<1x512xf32>
    %18 = vector.broadcast %17 : vector<1x512xf32> to vector<8x512xf32>
    %19 = arith.addf %16, %18 : vector<8x512xf32>
    %cst_16 = arith.constant 0.000000e+00 : f32
    %20 = vector.broadcast %cst_16 : f32 to vector<8x512xf32>
    %21 = arith.maximumf %19, %20 : vector<8x512xf32>
    %22 = arith.truncf %21 : vector<8x512xf32> to vector<8x512xbf16>
    %c0_17 = arith.constant 0 : index
    %c0_18 = arith.constant 0 : index
    %23 = vector.load %arg8[%c0_17, %c0_18] : memref<512x256xbf16, #tpu.memory_space<vmem>>, vector<512x256xbf16>
    %cst_19 = arith.constant dense<0.000000e+00> : vector<8x256xf32>
    %24 = tpu.matmul %22, %23, %cst_19 {dimension_numbers = #tpu.dot_dimension_numbers<[1], [0], [0], [1], [0, 0, 1, 1], [], []>} : vector<8x512xbf16>, vector<512x256xbf16>, vector<8x256xf32> -> vector<8x256xf32>
    %c0_20 = arith.constant 0 : index
    %c0_21 = arith.constant 0 : index
    %25 = vector.load %arg9[%c0_20, %c0_21] : memref<1x256xf32, #tpu.memory_space<vmem>>, vector<1x256xf32>
    %26 = vector.broadcast %25 : vector<1x256xf32> to vector<8x256xf32>
    %27 = arith.addf %24, %26 : vector<8x256xf32>
    %cst_22 = arith.constant 0.000000e+00 : f32
    %28 = vector.broadcast %cst_22 : f32 to vector<8x256xf32>
    %29 = arith.maximumf %27, %28 : vector<8x256xf32>
    %30 = arith.truncf %29 : vector<8x256xf32> to vector<8x256xbf16>
    %c0_23 = arith.constant 0 : index
    %c0_24 = arith.constant 0 : index
    %31 = vector.load %arg10[%c0_23, %c0_24] : memref<256x128xbf16, #tpu.memory_space<vmem>>, vector<256x128xbf16>
    %cst_25 = arith.constant dense<0.000000e+00> : vector<8x128xf32>
    %32 = tpu.matmul %30, %31, %cst_25 {dimension_numbers = #tpu.dot_dimension_numbers<[1], [0], [0], [1], [0, 0, 1, 1], [], []>} : vector<8x256xbf16>, vector<256x128xbf16>, vector<8x128xf32> -> vector<8x128xf32>
    %c0_26 = arith.constant 0 : index
    %c0_27 = arith.constant 0 : index
    %33 = vector.load %arg11[%c0_26, %c0_27] : memref<1x128xf32, #tpu.memory_space<vmem>>, vector<1x128xf32>
    %34 = vector.broadcast %33 : vector<1x128xf32> to vector<8x128xf32>
    %35 = arith.addf %32, %34 : vector<8x128xf32>
    %cst_28 = arith.constant 0.000000e+00 : f32
    %36 = vector.broadcast %cst_28 : f32 to vector<8x128xf32>
    %37 = arith.maximumf %35, %36 : vector<8x128xf32>
    %38 = arith.truncf %37 : vector<8x128xf32> to vector<8x128xbf16>
    %c0_29 = arith.constant 0 : index
    %c0_30 = arith.constant 0 : index
    %39 = vector.load %arg12[%c0_29, %c0_30] : memref<128x128xbf16, #tpu.memory_space<vmem>>, vector<128x128xbf16>
    %cst_31 = arith.constant dense<0.000000e+00> : vector<8x128xf32>
    %40 = tpu.matmul %38, %39, %cst_31 {dimension_numbers = #tpu.dot_dimension_numbers<[1], [0], [0], [1], [0, 0, 1, 1], [], []>} : vector<8x128xbf16>, vector<128x128xbf16>, vector<8x128xf32> -> vector<8x128xf32>
    %c0_32 = arith.constant 0 : index
    %c0_33 = arith.constant 0 : index
    %41 = vector.load %arg13[%c0_32, %c0_33] : memref<1x128xf32, #tpu.memory_space<vmem>>, vector<1x128xf32>
    %42 = vector.broadcast %41 : vector<1x128xf32> to vector<8x128xf32>
    %43 = arith.addf %40, %42 : vector<8x128xf32>
    %c0_34 = arith.constant 0 : index
    %c0_35 = arith.constant 0 : index
    %44 = vector.load %arg14[%c0_34, %c0_35] : memref<8x128xf32, #tpu.memory_space<vmem>>, vector<8x128xf32>
    tpu.vector_store %arg14[%c0_34, %c0_35], %43 {strides = array<i32>} : memref<8x128xf32, #tpu.memory_space<vmem>>, vector<8x128xf32>,
    return
  }
  func.func @transform_0(%arg0: i32) -> (i32, i32) {
    %c0_i32 = arith.constant 0 : i32
    %c0_i32_0 = arith.constant 0 : i32
    return %arg0, %c0_i32 : i32, i32
  }
  func.func @transform_1(%arg0: i32) -> (i32, i32) {
    %c0_i32 = arith.constant 0 : i32
    %c0_i32_0 = arith.constant 0 : i32
    return %arg0, %c0_i32 : i32, i32
  }
  func.func @transform_2(%arg0: i32) -> (i32, i32) {
    %c0_i32 = arith.constant 0 : i32
    %c0_i32_0 = arith.constant 0 : i32
    %c0_i32_1 = arith.constant 0 : i32
    return %c0_i32, %c0_i32_0 : i32, i32
  }
  func.func @transform_3(%arg0: i32) -> (i32, i32) {
    %c0_i32 = arith.constant 0 : i32
    %c0_i32_0 = arith.constant 0 : i32
    %c0_i32_1 = arith.constant 0 : i32
    return %c0_i32, %c0_i32_0 : i32, i32
  }
  func.func @transform_4(%arg0: i32) -> (i32, i32) {
    %c0_i32 = arith.constant 0 : i32
    %c0_i32_0 = arith.constant 0 : i32
    %c0_i32_1 = arith.constant 0 : i32
    return %c0_i32, %c0_i32_0 : i32, i32
  }
  func.func @transform_5(%arg0: i32) -> (i32, i32) {
    %c0_i32 = arith.constant 0 : i32
    %c0_i32_0 = arith.constant 0 : i32
    %c0_i32_1 = arith.constant 0 : i32
    return %c0_i32, %c0_i32_0 : i32, i32
  }
  func.func @transform_6(%arg0: i32) -> (i32, i32) {
    %c0_i32 = arith.constant 0 : i32
    %c0_i32_0 = arith.constant 0 : i32
    %c0_i32_1 = arith.constant 0 : i32
    return %c0_i32, %c0_i32_0 : i32, i32
  }
  func.func @transform_7(%arg0: i32) -> (i32, i32) {
    %c0_i32 = arith.constant 0 : i32
    %c0_i32_0 = arith.constant 0 : i32
    %c0_i32_1 = arith.constant 0 : i32
    return %c0_i32, %c0_i32_0 : i32, i32
  }
  func.func @transform_8(%arg0: i32) -> (i32, i32) {
    %c0_i32 = arith.constant 0 : i32
    %c0_i32_0 = arith.constant 0 : i32
    %c0_i32_1 = arith.constant 0 : i32
    return %c0_i32, %c0_i32_0 : i32, i32
  }
  func.func @transform_9(%arg0: i32) -> (i32, i32) {
    %c0_i32 = arith.constant 0 : i32
    %c0_i32_0 = arith.constant 0 : i32
    %c0_i32_1 = arith.constant 0 : i32
    return %c0_i32, %c0_i32_0 : i32, i32
  }
  func.func @transform_10(%arg0: i32) -> (i32, i32) {
    %c0_i32 = arith.constant 0 : i32
    %c0_i32_0 = arith.constant 0 : i32
    %c0_i32_1 = arith.constant 0 : i32
    return %c0_i32, %c0_i32_0 : i32, i32
  }
  func.func @transform_11(%arg0: i32) -> (i32, i32) {
    %c0_i32 = arith.constant 0 : i32
    %c0_i32_0 = arith.constant 0 : i32
    %c0_i32_1 = arith.constant 0 : i32
    return %c0_i32, %c0_i32_0 : i32, i32
  }
  func.func @transform_12(%arg0: i32) -> (i32, i32) {
    %c0_i32 = arith.constant 0 : i32
    %c0_i32_0 = arith.constant 0 : i32
    %c0_i32_1 = arith.constant 0 : i32
    return %c0_i32, %c0_i32_0 : i32, i32
  }
  func.func @transform_13(%arg0: i32) -> (i32, i32) {
    %c0_i32 = arith.constant 0 : i32
    %c0_i32_0 = arith.constant 0 : i32
    return %arg0, %c0_i32 : i32, i32
  }
}

</mosaic_0001>

<bundles_post_ra>
// kernel: critic_forward.1
= control target key start
LH: loop header
LB: loop body
LE: loop exit
PB: predicated region body
PF: predicated region fallthrough
CT: control target
= control target key end

     0   :  { %18 = vsyncpa [#allocation3], 0  ;;  %s4656_s0 = inlined_call_operand.vmem [shape: f32[8,32], index: 0, kind: input, shape index: {}]   ;;  %s4657_s1 = inlined_call_operand.vmem [shape: f32[8,16], index: 1, kind: input, shape index: {}]   ;;  %s4658_s2 = inlined_call_operand.hbm [shape: bf16[32,1024], index: 2, kind: input, shape index: {}]   ;;  %s4659_s3 = inlined_call_operand.hbm [shape: f32[1,1024], index: 3, kind: input, shape index: {}]   ;;  %s4660_s4 = inlined_call_operand.hbm [shape: bf16[1024,512], index: 4, kind: input, shape index: {}]   ;;  %s4661_s5 = inlined_call_operand.hbm [shape: bf16[16,512], index: 5, kind: input, shape index: {}]   ;;  %s4662_s6 = inlined_call_operand.vmem [shape: f32[1,512], index: 6, kind: input, shape index: {}]   ;;  %s4663_s7 = inlined_call_operand.hbm [shape: bf16[512,256], index: 7, kind: input, shape index: {}]   ;;  %s4664_s8 = inlined_call_operand.vmem [shape: f32[1,256], index: 8, kind: input, shape index: {}]   ;;  %s4665_s9 = inlined_call_operand.hbm [shape: bf16[256,128], index: 9, kind: input, shape index: {}]   ;;  %s4666_s10 = inlined_call_operand.vmem [shape: f32[1,128], index: 10, kind: input, shape index: {}]   ;;  %s4667_s11 = inlined_call_operand.vmem [shape: bf16[128,128], index: 11, kind: input, shape index: {}]   ;;  %s4668_s12 = inlined_call_operand.vmem [shape: f32[1,128], index: 12, kind: input, shape index: {}]   ;;  %s4669_s13 = inlined_call_operand.vmem [shape: f32[8,128], index: 13, kind: output, shape index: {}]  }
   0x1   :  { %19 = vsyncpa [#allocation5], 0 }
   0x2   :  { %20 = vsyncpa [#allocation8], 0 }
   0x3   :  { %21 = vsyncpa [#allocation11], 0  ;;  %s4334_s25 = smov [#allocation4]   ;;  %s4194_s29 = scalar_lea.hbm %s4659_s3, 128 }
   0x4   :  { %s44_s26 = sshll.u32 %s4334_s25, 4  ;;  %p4195_p0 = scmp.ne.s32.totalorder %s4659_s3, %s4194_s29  ;;  %s45_s26 = int_to_ptr.vmem [resolvable:$true] %s44_s26 }
   0x5   :  { %p4198_p1 = scmp.lt.u32.totalorder %s4194_s29, %s4659_s3 }
   0x7   :  { %p4200_p2 = pnand %p4198_p1, %p4195_p0 }
   0x9   :  { %4203 = shalt.err (!%p4200_p2)
}
   0xa   :  { %s4204_s17 = scalar_lea.vmem %s45_s26, 128  ;;  %p4209_p4 = scmp.lt.s32.totalorder %s45_s26, %s45_s26 }
   0xb   :  { %p4205_p3 = scmp.ne.s32.totalorder %s45_s26, %s4204_s17  ;;  %p4210_p5 = scmp.lt.s32.totalorder %s4204_s17, %s4204_s17 }
   0xd   :  { %p4211_p6 = por %p4210_p5, %p4209_p4 }
   0xf   :  { %p4212_p7 = pnand %p4211_p6, %p4205_p3 }
  0x11   :  { %4215 = shalt.err (!%p4212_p7)
}
  0x12   :  { %47 = dma.hbm_to_vmem [thread:$0]  %s4659_s3, 128, %s45_s26, [#allocation5]  }
  0x13   :  { %s4335_s20 = smov [#allocation7]   ;;  %s4336_s22 = smov [#allocation2]  }
  0x14   :  { %s65_s21 = sshll.u32 %s4335_s20, 4  ;;  %s31_s23 = sshll.u32 %s4336_s22, 4  ;;  %s66_s21 = int_to_ptr.vmem [resolvable:$true] %s65_s21  ;;  %s32_s23 = int_to_ptr.vmem [resolvable:$true] %s31_s23 }
  0x15   :  { %s4216_s27 = scalar_lea.hbm %s4661_s5, 512 }
  0x16   :  { %p4217_p8 = scmp.ne.s32.totalorder %s4661_s5, %s4216_s27  ;;  %p4220_p9 = scmp.lt.u32.totalorder %s4216_s27, %s4661_s5 }
  0x18   :  { %p4222_p10 = pnand %p4220_p9, %p4217_p8 }
  0x1a   :  { %4225 = shalt.err (!%p4222_p10)
}
  0x1b   :  { %s4226_s3 = scalar_lea.vmem %s66_s21, 512  ;;  %p4231_p12 = scmp.lt.s32.totalorder %s66_s21, %s66_s21 }
  0x1c   :  { %p4227_p11 = scmp.ne.s32.totalorder %s66_s21, %s4226_s3  ;;  %p4232_p13 = scmp.lt.s32.totalorder %s4226_s3, %s4226_s3 }
  0x1e   :  { %p4233_p0 = por %p4232_p13, %p4231_p12 }
  0x20   :  { %p4234_p1 = pnand %p4233_p0, %p4227_p11 }
  0x22   :  { %4237 = shalt.err (!%p4234_p1)
}
  0x23   :  { %s4337_s26 = smov 256   ;;  %s4338_s15 = smov 16  }
  0x24   :  { %71 = dma.hbm_to_vmem [thread:$0]  %s4661_s5, 512, %s66_s21, [#allocation8], %s4337_s26, %s4337_s26, %s4338_s15  }
  0x25   :  { %s4238_s20 = scalar_lea.hbm %s4658_s2, 2048 }
  0x26   :  { %p4239_p2 = scmp.ne.s32.totalorder %s4658_s2, %s4238_s20  ;;  %p4242_p3 = scmp.lt.u32.totalorder %s4238_s20, %s4658_s2 }
  0x28   :  { %p4244_p4 = pnand %p4242_p3, %p4239_p2 }
  0x2a   :  { %4247 = shalt.err (!%p4244_p4)
}
  0x2b   :  { %s4248_s28 = scalar_lea.vmem %s32_s23, 2048  ;;  %p4253_p6 = scmp.lt.s32.totalorder %s32_s23, %s32_s23 }
  0x2c   :  { %p4249_p5 = scmp.ne.s32.totalorder %s32_s23, %s4248_s28  ;;  %p4254_p7 = scmp.lt.s32.totalorder %s4248_s28, %s4248_s28 }
  0x2e   :  { %p4255_p8 = por %p4254_p7, %p4253_p6 }
  0x30   :  { %p4256_p9 = pnand %p4255_p8, %p4249_p5 }
  0x32   :  { %4259 = shalt.err (!%p4256_p9)
}
  0x33   :  { %s4339_s5 = smov 512   ;;  %s4340_s21 = smov 32  }
  0x34   :  { %37 = dma.hbm_to_vmem [thread:$0]  %s4658_s2, 2048, %s32_s23, [#allocation3], %s4339_s5, %s4339_s5, %s4340_s21  }
  0x35   :  { %s4341_s14 = smov [#allocation6]   ;;  %s4342_s16 = smov [#allocation9]  }
  0x36   :  { %s53_s3 = sshll.u32 %s4341_s14, 4  ;;  %s79_s17 = sshll.u32 %s4342_s16, 4  ;;  %s54_s3 = int_to_ptr.vmem [resolvable:$true] %s53_s3  ;;  %s80_s17 = int_to_ptr.vmem [resolvable:$true] %s79_s17 }
  0x37   :  { %s4260_s20 = scalar_lea.hbm %s4660_s4, 32768 }
  0x38   :  { %p4261_p10 = scmp.ne.s32.totalorder %s4660_s4, %s4260_s20  ;;  %p4264_p11 = scmp.lt.u32.totalorder %s4260_s20, %s4660_s4 }
  0x3a   :  { %p4266_p12 = pnand %p4264_p11, %p4261_p10 }
  0x3c   :  { %4269 = shalt.err (!%p4266_p12)
}
  0x3d   :  { %s4270_s2 = scalar_lea.vmem %s54_s3, 32768  ;;  %p4275_p0 = scmp.lt.s32.totalorder %s54_s3, %s54_s3 }
  0x3e   :  { %p4271_p13 = scmp.ne.s32.totalorder %s54_s3, %s4270_s2  ;;  %p4276_p1 = scmp.lt.s32.totalorder %s4270_s2, %s4270_s2 }
  0x40   :  { %p4277_p2 = por %p4276_p1, %p4275_p0 }
  0x42   :  { %p4278_p3 = pnand %p4277_p2, %p4271_p13 }
  0x44   :  { %4281 = shalt.err (!%p4278_p3)
}
  0x45   :  { %59 = dma.hbm_to_vmem [thread:$0]  %s4660_s4, 32768, %s54_s3, [#allocation5], %s4337_s26, %s4337_s26, %s4338_s15  }
  0x46   :  { %s4282_s29 = scalar_lea.hbm %s4663_s7, 8192 }
  0x47   :  { %p4283_p4 = scmp.ne.s32.totalorder %s4663_s7, %s4282_s29  ;;  %p4286_p5 = scmp.lt.u32.totalorder %s4282_s29, %s4663_s7 }
  0x49   :  { %p4288_p6 = pnand %p4286_p5, %p4283_p4 }
  0x4b   :  { %4291 = shalt.err (!%p4288_p6)
}
  0x4c   :  { %s4292_s19 = scalar_lea.vmem %s80_s17, 8192  ;;  %p4297_p8 = scmp.lt.s32.totalorder %s80_s17, %s80_s17 }
  0x4d   :  { %p4293_p7 = scmp.ne.s32.totalorder %s80_s17, %s4292_s19  ;;  %p4298_p9 = scmp.lt.s32.totalorder %s4292_s19, %s4292_s19 }
  0x4f   :  { %p4299_p10 = por %p4298_p9, %p4297_p8 }
  0x51   :  { %p4300_p11 = pnand %p4299_p10, %p4293_p7 }
  0x53   :  { %4303 = shalt.err (!%p4300_p11)
}
  0x54   :  { %s4343_s4 = smov 128   ;;  %s4344_s26 = smov 8  }
  0x55   :  { %85 = dma.hbm_to_vmem [thread:$0]  %s4663_s7, 8192, %s80_s17, [#allocation8], %s4343_s4, %s4343_s4, %s4344_s26  }
  0x56   :  { %s4345_s20 = smov [#allocation10]   ;;  %s4304_s27 = scalar_lea.hbm %s4665_s9, 2048 }
  0x57   :  { %s93_s22 = sshll.u32 %s4345_s20, 4  ;;  %p4305_p12 = scmp.ne.s32.totalorder %s4665_s9, %s4304_s27  ;;  %s94_s22 = int_to_ptr.vmem [resolvable:$true] %s93_s22 }
  0x58   :  { %p4308_p13 = scmp.lt.u32.totalorder %s4304_s27, %s4665_s9 }
  0x5a   :  { %p4310_p0 = pnand %p4308_p13, %p4305_p12 }
  0x5c   :  { %4313 = shalt.err (!%p4310_p0)
}
  0x5d   :  { %s4314_s21 = scalar_lea.vmem %s94_s22, 2048  ;;  %p4319_p2 = scmp.lt.s32.totalorder %s94_s22, %s94_s22 }
  0x5e   :  { %p4315_p1 = scmp.ne.s32.totalorder %s94_s22, %s4314_s21  ;;  %p4320_p3 = scmp.lt.s32.totalorder %s4314_s21, %s4314_s21 }
  0x60   :  { %p4321_p4 = por %p4320_p3, %p4319_p2 }
  0x62   :  { %p4322_p5 = pnand %p4321_p4, %p4315_p1 }
  0x64   :  { %4325 = shalt.err (!%p4322_p5)
}
  0x65   :  { %s4346_s7 = smov 64   ;;  %s4347_s17 = smov 4  }
  0x66   :  { %99 = dma.hbm_to_vmem [thread:$0]  %s4665_s9, 2048, %s94_s22, [#allocation11], %s4346_s7, %s4346_s7, %s4347_s17  }
  0x67   :  { %4326 = dma.done.wait [#allocation3], 2048  }
  0x68   :  { %4327 = vsyncadd [#allocation3], 4294965248 }
  0x69   :  { %4328 = dma.done.wait [#allocation5], 32896  }
  0x6a   :  { %4329 = vsyncadd [#allocation5], 4294934400 }
  0x6b   :  { %4330 = dma.done.wait [#allocation8], 8704  }
  0x6c   :  { %4331 = vsyncadd [#allocation8], 4294958592 }
  0x6d   :  { %4332 = dma.done.wait [#allocation11], 2048  }
  0x6e   :  { %4333 = vsyncadd [#allocation11], 4294965248  ;;  %v4348_v0 = vmov 0   ;;  %v129_v1 = vld [vmem:[#allocation2] sm:$0xff]  ;;  %v130_v8 = vld [vmem:[#allocation2 + $0x8] sm:$0xff]  ;;  %vm267_vm0 = vcmask 261120  }
  0x6f   :  { %303 = vmatprep.mubr.bf16.mxu1 %v4348_v0  ;;  %v133_v2 = vld [vmem:[#allocation2 + $0x20] sm:$0xff]  ;;  %v134_v9 = vld [vmem:[#allocation2 + $0x28] sm:$0xff]  ;;  %v131_v19 = vld [vmem:[#allocation2 + $0x10] sm:$0xff]  ;;  %vm731_vm1 = vcmask 130048   ;;  %vm4350_vm2 = vmmov 0  }
  0x70   :  { %v137_v3 = vld [vmem:[#allocation2 + $0x40] sm:$0xff]  ;;  %v3239_v4 = vcombine.high %v129_v1, %v133_v2  ;;  %v3238_v5 = vcombine.low %v129_v1, %v133_v2  ;;  %v3241_v12 = vcombine.high %v130_v8, %v134_v9  ;;  %v138_v13 = vld [vmem:[#allocation2 + $0x48] sm:$0xff]  ;;  %v3240_v16 = vcombine.low %v130_v8, %v134_v9  ;;  %v135_v20 = vld [vmem:[#allocation2 + $0x30] sm:$0xff] }
  0x71   :  { %v141_v6 = vld [vmem:[#allocation2 + $0x60] sm:$0xff]  ;;  %v142_v14 = vld [vmem:[#allocation2 + $0x68] sm:$0xff]  ;;  %v3243_v26 = vcombine.high %v131_v19, %v135_v20  ;;  %v139_v27 = vld [vmem:[#allocation2 + $0x50] sm:$0xff]  ;;  %v3242_v30 = vcombine.low %v131_v19, %v135_v20 }
  0x72   :  { %v3247_v7 = vcombine.high %v137_v3, %v141_v6  ;;  %271 = vmatprep.subr.bf16.mxu1 %v3239_v4  ;;  %v3246_v10 = vcombine.low %v137_v3, %v141_v6  ;;  %v125_v11 = vld [vmem:[%s4656_s0] sm:$0xff]  ;;  %v3687_v17 = vld [vmem:[#allocation6 + $0x4] ss:$16 sps:$4 sm:$0xff]   ;;  %v3249_v18 = vcombine.high %v138_v13, %v142_v14  ;;  %v3692_v21 = vld [vmem:[#allocation6] ss:$16 sps:$4 sm:$0xff]   ;;  %v3248_v24 = vcombine.low %v138_v13, %v142_v14 }
  0x73   :  { %272 = vmatpush1.bf16.msra.mxu1 %v3238_v5  ;;  %v4503_v15 = vpack.c.bf16 %v125_v11, %v125_v11  ;;  %2097 = vmatprep.subr.bf16.mxu0 %v3687_v17  ;;  %v3693_v22 = vld [vmem:[#allocation6 + $0x24] ss:$16 sps:$4 sm:$0xff]   ;;  %v3695_v23 = vld [vmem:[#allocation6 + $0x20] ss:$16 sps:$4 sm:$0xff]   ;;  %v143_v28 = vld [vmem:[#allocation2 + $0x70] sm:$0xff] }
  0x74   :  { %273 = vmatprep.subr.bf16.mxu1 %v3247_v7  ;;  %2098 = vmatpush1.bf16.msra.mxu0 %v3692_v21  ;;  %v3696_v25 = vld [vmem:[#allocation6 + $0x44] ss:$16 sps:$4 sm:$0xff]   ;;  %v3701_v29 = vld [vmem:[#allocation6 + $0x40] ss:$16 sps:$4 sm:$0xff]   ;;  %v3251_v31 = vcombine.high %v139_v27, %v143_v28  ;;  %v3250_v36 = vcombine.low %v139_v27, %v143_v28  ;;  %v3691_v51 = vld [vmem:[#allocation7 + $0xc] ss:$16 sps:$4 sm:$0xff]  }
  0x75   :  { %2099 = vmatprep.subr.bf16.mxu0 %v3693_v22  ;;  %v3702_v32 = vld [vmem:[#allocation6 + $0x64] ss:$16 sps:$4 sm:$0xff]   ;;  %v3707_v35 = vld [vmem:[#allocation6 + $0x60] ss:$16 sps:$4 sm:$0xff]   ;;  %v127_v53 = vld [vmem:[%s4657_s1] sm:$0xff] }
  0x76   :  { %v132_v33 = vld [vmem:[#allocation2 + $0x18] sm:$0xff]  ;;  %v128_v56 = vpack.c.bf16 %v127_v53, %v127_v53  ;;  %v3689_v58 = vld [vmem:[#allocation7 + $0x8] ss:$16 sps:$4 sm:$0xff]  }
  0x77   :  { %274 = vmatpush1.bf16.msra.mxu1 %v3246_v10  ;;  %v136_v34 = vld [vmem:[#allocation2 + $0x38] sm:$0xff] }
  0x78   :  { %312 = vmatprep.subr.bf16.mxu1 %v3241_v12  ;;  %2100 = vmatpush1.bf16.msra.mxu0 %v3695_v23  ;;  %v3708_v37 = vld [vmem:[#allocation6 + $0x84] ss:$16 sps:$4 sm:$0xff]   ;;  %v3245_v38 = vcombine.high %v132_v33, %v136_v34  ;;  %v3713_v41 = vld [vmem:[#allocation6 + $0x80] ss:$16 sps:$4 sm:$0xff]   ;;  %v3244_v42 = vcombine.low %v132_v33, %v136_v34 }
  0x79   :  { %2101 = vmatprep.subr.bf16.mxu0 %v3696_v25  ;;  %v140_v39 = vld [vmem:[#allocation2 + $0x58] sm:$0xff] }
  0x7a   :  { %3254 = vmatmul.mubr.msk.bf16.vlgmr.msra.gmra.mrb[0].mxu1 %vm267_vm0, %v4503_v15  ;;  %v144_v40 = vld [vmem:[#allocation2 + $0x78] sm:$0xff] }
  0x7b   :  { %313 = vmatpush1.bf16.msra.mxu1 %v3240_v16  ;;  %344 = vmatprep.mubr.bf16.mxu1 %v4348_v0  ;;  %v3253_v43 = vcombine.high %v140_v39, %v144_v40  ;;  %v3714_v44 = vld [vmem:[#allocation6 + $0xa4] ss:$16 sps:$4 sm:$0xff]   ;;  %v3719_v45 = vld [vmem:[#allocation6 + $0xa0] ss:$16 sps:$4 sm:$0xff]   ;;  %v3252_v46 = vcombine.low %v140_v39, %v144_v40 }
  0x7c   :  { %314 = vmatprep.subr.bf16.mxu1 %v3249_v18  ;;  %2102 = vmatpush1.bf16.msra.mxu0 %v3701_v29  ;;  %v3720_v47 = vld [vmem:[#allocation6 + $0xc4] ss:$16 sps:$4 sm:$0xff]   ;;  %v3725_v49 = vld [vmem:[#allocation6 + $0xc0] ss:$16 sps:$4 sm:$0xff]  }
  0x7d   :  { %2103 = vmatprep.subr.bf16.mxu0 %v3702_v32  ;;  %v3686_v48 = vld [vmem:[#allocation7 + $0x4] ss:$16 sps:$4 sm:$0xff]   ;;  %v3684_v50 = vld [vmem:[#allocation7] ss:$16 sps:$4 sm:$0xff]  }
  0x7e   :  { %v3726_v52 = vld [vmem:[#allocation6 + $0xe4] ss:$16 sps:$4 sm:$0xff]   ;;  %v3731_v54 = vld [vmem:[#allocation6 + $0xe0] ss:$16 sps:$4 sm:$0xff]  }
  0x7f   :  { %315 = vmatpush1.bf16.msra.mxu1 %v3248_v24  ;;  %v3732_v55 = vld [vmem:[#allocation6 + $0x104] ss:$16 sps:$4 sm:$0xff]   ;;  %v3737_v57 = vld [vmem:[#allocation6 + $0x100] ss:$16 sps:$4 sm:$0xff]  }
  0x80   :  { %353 = vmatprep.subr.bf16.mxu1 %v3243_v26  ;;  %2104 = vmatpush1.bf16.msra.mxu0 %v3707_v35  ;;  %v3700_v59 = vld [vmem:[#allocation6 + $0x204] ss:$16 sps:$4 sm:$0xff]   ;;  %v3743_v61 = vld [vmem:[#allocation6 + $0x120] ss:$16 sps:$4 sm:$0xff]  }
  0x81   :  { %2105 = vmatprep.subr.bf16.mxu0 %v3708_v37  ;;  %v3738_v60 = vld [vmem:[#allocation6 + $0x124] ss:$16 sps:$4 sm:$0xff]   ;;  %v3749_v63 = vld [vmem:[#allocation6 + $0x140] ss:$16 sps:$4 sm:$0xff]  }
  0x82   :  { %3255 = vmatmul.mubr.msk.bf16.vlgmr.msra.gmra.mrb[4].mxu1 %vm267_vm0, %v4503_v15  ;;  %v3744_v62 = vld [vmem:[#allocation6 + $0x144] ss:$16 sps:$4 sm:$0xff]   ;;  %v3698_v1 = vld [vmem:[#allocation6 + $0x200] ss:$16 sps:$4 sm:$0xff]  }
  0x83   :  { %354 = vmatpush1.bf16.msra.mxu1 %v3242_v30  ;;  %385 = vmatprep.mubr.bf16.mxu1 %v4348_v0  ;;  %v3750_v2 = vld [vmem:[#allocation6 + $0x164] ss:$16 sps:$4 sm:$0xff]   ;;  %v3755_v4 = vld [vmem:[#allocation6 + $0x160] ss:$16 sps:$4 sm:$0xff]  }
  0x84   :  { %355 = vmatprep.subr.bf16.mxu1 %v3251_v31  ;;  %2106 = vmatpush1.bf16.msra.mxu0 %v3713_v41  ;;  %v3706_v3 = vld [vmem:[#allocation6 + $0x224] ss:$16 sps:$4 sm:$0xff]   ;;  %v3704_v5 = vld [vmem:[#allocation6 + $0x220] ss:$16 sps:$4 sm:$0xff]  }
  0x85   :  { %2107 = vmatprep.subr.bf16.mxu0 %v3714_v44  ;;  %v3756_v6 = vld [vmem:[#allocation6 + $0x184] ss:$16 sps:$4 sm:$0xff]   ;;  %v3761_v8 = vld [vmem:[#allocation6 + $0x180] ss:$16 sps:$4 sm:$0xff]  }
  0x86   :  { %v3712_v7 = vld [vmem:[#allocation6 + $0x244] ss:$16 sps:$4 sm:$0xff]   ;;  %v3767_v11 = vld [vmem:[#allocation6 + $0x1a0] ss:$16 sps:$4 sm:$0xff]  }
  0x87   :  { %356 = vmatpush1.bf16.msra.mxu1 %v3250_v36  ;;  %v3762_v9 = vld [vmem:[#allocation6 + $0x1a4] ss:$16 sps:$4 sm:$0xff]   ;;  %v3716_v12 = vld [vmem:[#allocation6 + $0x260] ss:$16 sps:$4 sm:$0xff]  }
  0x88   :  { %394 = vmatprep.subr.bf16.mxu1 %v3245_v38  ;;  %2108 = vmatpush1.bf16.msra.mxu0 %v3719_v45  ;;  %v3718_v10 = vld [vmem:[#allocation6 + $0x264] ss:$16 sps:$4 sm:$0xff]   ;;  %v3722_v14 = vld [vmem:[#allocation6 + $0x280] ss:$16 sps:$4 sm:$0xff]  }
  0x89   :  { %2109 = vmatprep.subr.bf16.mxu0 %v3720_v47  ;;  %v3724_v13 = vld [vmem:[#allocation6 + $0x284] ss:$16 sps:$4 sm:$0xff]   ;;  %v3728_v16 = vld [vmem:[#allocation6 + $0x2a0] ss:$16 sps:$4 sm:$0xff]  }
  0x8a   :  { %3256 = vmatmul.mubr.msk.bf16.vlgmr.msra.gmra.mrb[8].mxu1 %vm267_vm0, %v4503_v15  ;;  %v3736_v17 = vld [vmem:[#allocation6 + $0x2c4] ss:$16 sps:$4 sm:$0xff]   ;;  %v3734_v18 = vld [vmem:[#allocation6 + $0x2c0] ss:$16 sps:$4 sm:$0xff]  }
  0x8b   :  { %395 = vmatpush1.bf16.msra.mxu1 %v3244_v42  ;;  %426 = vmatprep.mubr.bf16.mxu1 %v4348_v0  ;;  %v3742_v19 = vld [vmem:[#allocation6 + $0x2e4] ss:$16 sps:$4 sm:$0xff]   ;;  %v3740_v20 = vld [vmem:[#allocation6 + $0x2e0] ss:$16 sps:$4 sm:$0xff]  }
  0x8c   :  { %396 = vmatprep.subr.bf16.mxu1 %v3253_v43  ;;  %2110 = vmatpush1.bf16.msra.mxu0 %v3725_v49  ;;  %v3748_v21 = vld [vmem:[#allocation6 + $0x304] ss:$16 sps:$4 sm:$0xff]   ;;  %v3746_v22 = vld [vmem:[#allocation6 + $0x300] ss:$16 sps:$4 sm:$0xff]   ;;  %v147_v43 = vlaneseq }
  0x8d   :  { %2111 = vmatprep.subr.bf16.mxu0 %v3726_v52  ;;  %v3754_v23 = vld [vmem:[#allocation6 + $0x324] ss:$16 sps:$4 sm:$0xff]   ;;  %v3752_v24 = vld [vmem:[#allocation6 + $0x320] ss:$16 sps:$4 sm:$0xff]  }
  0x8e   :  { %v3760_v25 = vld [vmem:[#allocation6 + $0x344] ss:$16 sps:$4 sm:$0xff]   ;;  %v3758_v26 = vld [vmem:[#allocation6 + $0x340] ss:$16 sps:$4 sm:$0xff]   ;;  %v4523_v44 = vshrl.u32 %v147_v43, 7 }
  0x8f   :  { %397 = vmatpush1.bf16.msra.mxu1 %v3252_v46  ;;  %v3766_v27 = vld [vmem:[#allocation6 + $0x364] ss:$16 sps:$4 sm:$0xff]   ;;  %v3764_v28 = vld [vmem:[#allocation6 + $0x360] ss:$16 sps:$4 sm:$0xff]   ;;  %v4528_v46 = vld [vmem:[#allocation4] sm:$0xff] }
  0x90   :  { %735 = vmatprep.subr.bf16.mxu1 %v3686_v48  ;;  %2112 = vmatpush1.bf16.msra.mxu0 %v3731_v54  ;;  %v3768_v29 = vld [vmem:[#allocation6 + $0x1c4] ss:$16 sps:$4 sm:$0xff]   ;;  %v3773_v31 = vld [vmem:[#allocation6 + $0x1c0] ss:$16 sps:$4 sm:$0xff]   ;;  %v4526_v45 = vsub.s32 0, %v4523_v44  ;;  %v4531_v47 = vsub.s32 1, %v4523_v44 }
  0x91   :  { %2113 = vmatprep.subr.bf16.mxu0 %v3732_v55  ;;  %v3772_v30 = vld [vmem:[#allocation6 + $0x384] ss:$16 sps:$4 sm:$0xff]   ;;  %v3770_v32 = vld [vmem:[#allocation6 + $0x380] ss:$16 sps:$4 sm:$0xff]   ;;  %v157_v53 = vsub.s32 2, %v4523_v44 }
  0x92   :  { %3257 = vmatmul.mubr.msk.bf16.vlgmr.msra.gmra.mrb[12].mxu1 %vm267_vm0, %v4503_v15  ;;  %v3730_v15 = vld [vmem:[#allocation6 + $0x2a4] ss:$16 sps:$4 sm:$0xff]   ;;  %v3779_v35 = vld [vmem:[#allocation6 + $0x1e0] ss:$16 sps:$4 sm:$0xff]   ;;  %v150_v48 = vrot.slane %v4528_v46, %v4526_v45  ;;  %v154_v49 = vrot.slane %v4528_v46, %v4531_v47 }
  0x93   :  { %736 = vmatpush1.bf16.msra.mxu1 %v3684_v50  ;;  %767 = vmatprep.mubr.bf16.mxu1 %v4348_v0  ;;  %v3774_v33 = vld [vmem:[#allocation6 + $0x1e4] ss:$16 sps:$4 sm:$0xff]   ;;  %v3776_v36 = vld [vmem:[#allocation6 + $0x3a0] ss:$16 sps:$4 sm:$0xff]  }
  0x94   :  { %776 = vmatprep.subr.bf16.mxu1 %v3691_v51  ;;  %2114 = vmatpush1.bf16.msra.mxu0 %v3737_v57  ;;  %v3778_v34 = vld [vmem:[#allocation6 + $0x3a4] ss:$16 sps:$4 sm:$0xff]   ;;  %v3780_v39 = vld [vmem:[#allocation6 + $0x3c0] ss:$16 sps:$4 sm:$0xff]  }
  0x95   :  { %2115 = vmatprep.subr.bf16.mxu0 %v3738_v60  ;;  %v3785_v37 = vld [vmem:[#allocation6 + $0x404] ss:$16 sps:$4 sm:$0xff]   ;;  %v3786_v41 = vld [vmem:[#allocation6 + $0x3e0] ss:$16 sps:$4 sm:$0xff]   ;;  %v158_v60 = vrot.slane %v4528_v46, %v157_v53 }
  0x96   :  { %v3782_v38 = vld [vmem:[#allocation6 + $0x3c4] ss:$16 sps:$4 sm:$0xff]  }
  0x97   :  { %v3788_v40 = vld [vmem:[#allocation6 + $0x3e4] ss:$16 sps:$4 sm:$0xff]  }
  0x98   :  { %2116 = vmatpush1.bf16.msra.mxu0 %v3743_v61  ;;  %v3797_v42 = vld [vmem:[#allocation6 + $0x604] ss:$16 sps:$4 sm:$0xff]  }
  0x99   :  { %2117 = vmatprep.subr.bf16.mxu0 %v3744_v62  ;;  %v3783_v62 = vld [vmem:[#allocation6 + $0x400] ss:$16 sps:$4 sm:$0xff]   ;;  %v3818_v43 = vld [vmem:[#allocation6 + $0x4c4] ss:$16 sps:$4 sm:$0xff]  }
  0x9a   :  { %3262 = vmatmul.mubr.msk.bf16.vlgmr.msra.gmra.mrb[16].mxu1 %vm731_vm1, %v128_v56 }
  0x9b   :  { %777 = vmatpush1.bf16.msra.mxu1 %v3689_v58  ;;  %808 = vmatprep.mubr.bf16.mxu1 %v4348_v0  ;;  %v3710_v0 = vld [vmem:[#allocation6 + $0x240] ss:$16 sps:$4 sm:$0xff]  }
  0x9c   :  { %2138 = vmatprep.subr.bf16.mxu1 %v3700_v59  ;;  %2118 = vmatpush1.bf16.msra.mxu0 %v3749_v63 }
  0x9d   :  { %2119 = vmatprep.subr.bf16.mxu0 %v3750_v2  ;;  %v3791_v2 = vld [vmem:[#allocation6 + $0x424] ss:$16 sps:$4 sm:$0xff]  }
  0xa0   :  { %2120 = vmatpush1.bf16.msra.mxu0 %v3755_v4 }
  0xa1   :  { %2121 = vmatprep.subr.bf16.mxu0 %v3756_v6 }
  0xa2   :  { %3263 = vmatmul.mubr.msk.bf16.vlgmr.msra.gmra.mrb[20].mxu1 %vm731_vm1, %v128_v56  ;;  %v161_v56 = vsub.s32 3, %v4523_v44 }
  0xa3   :  { %2139 = vmatpush1.bf16.msra.mxu1 %v3698_v1 }
  0xa4   :  { %2140 = vmatprep.subr.bf16.mxu1 %v3706_v3  ;;  %2122 = vmatpush1.bf16.msra.mxu0 %v3761_v8  ;;  %v162_v63 = vrot.slane %v4528_v46, %v161_v56  ;;  %v3789_v8 = vld [vmem:[#allocation6 + $0x420] ss:$16 sps:$4 sm:$0xff]  }
  0xa5   :  { %2123 = vmatprep.subr.bf16.mxu0 %v3762_v9 }
  0xa7   :  { %2141 = vmatpush1.bf16.msra.mxu1 %v3704_v5 }
  0xa8   :  { %2142 = vmatprep.subr.bf16.mxu1 %v3712_v7  ;;  %2124 = vmatpush1.bf16.msra.mxu0 %v3767_v11  ;;  %v3794_v11 = vld [vmem:[#allocation6 + $0x444] ss:$16 sps:$4 sm:$0xff]  }
  0xa9   :  { %2125 = vmatprep.subr.bf16.mxu0 %v3768_v29 }
  0xab   :  { %2143 = vmatpush1.bf16.msra.mxu1 %v3710_v0  ;;  %v169_v0 = vsub.s32 5, %v4523_v44 }
  0xac   :  { %2144 = vmatprep.subr.bf16.mxu1 %v3718_v10  ;;  %2126 = vmatpush1.bf16.msra.mxu0 %v3773_v31  ;;  %v3804_v31 = vld [vmem:[#allocation6 + $0x480] ss:$16 sps:$4 sm:$0xff]  }
  0xad   :  { %2127 = vmatprep.subr.bf16.mxu0 %v3774_v33 }
  0xaf   :  { %2145 = vmatpush1.bf16.msra.mxu1 %v3716_v12 }
  0xb0   :  { %2146 = vmatprep.subr.bf16.mxu1 %v3724_v13  ;;  %2128 = vmatpush1.bf16.msra.mxu0 %v3779_v35  ;;  %v3812_v35 = vld [vmem:[#allocation6 + $0x4a4] ss:$16 sps:$4 sm:$0xff]  }
  0xb1   :  { %2179 = vmatprep.subr.bf16.mxu0 %v3785_v37 }
  0xb3   :  { %2147 = vmatpush1.bf16.msra.mxu1 %v3722_v14  ;;  %v3792_v14 = vld [vmem:[#allocation6 + $0x440] ss:$16 sps:$4 sm:$0xff]  }
  0xb4   :  { %2148 = vmatprep.subr.bf16.mxu1 %v3730_v15  ;;  %v3795_v15 = vld [vmem:[#allocation6 + $0x600] ss:$16 sps:$4 sm:$0xff]  }
  0xb7   :  { %2149 = vmatpush1.bf16.msra.mxu1 %v3728_v16  ;;  %v170_v16 = vrot.slane %v4528_v46, %v169_v0 }
  0xb8   :  { %2150 = vmatprep.subr.bf16.mxu1 %v3736_v17 }
  0xbb   :  { %2151 = vmatpush1.bf16.msra.mxu1 %v3734_v18  ;;  %v3800_v18 = vld [vmem:[#allocation6 + $0x464] ss:$16 sps:$4 sm:$0xff]  }
  0xbc   :  { %2152 = vmatprep.subr.bf16.mxu1 %v3742_v19  ;;  %v3803_v19 = vld [vmem:[#allocation6 + $0x624] ss:$16 sps:$4 sm:$0xff]  }
  0xbf   :  { %2153 = vmatpush1.bf16.msra.mxu1 %v3740_v20 }
  0xc0   :  { %2154 = vmatprep.subr.bf16.mxu1 %v3748_v21 }
  0xc3   :  { %2155 = vmatpush1.bf16.msra.mxu1 %v3746_v22  ;;  %v3798_v22 = vld [vmem:[#allocation6 + $0x460] ss:$16 sps:$4 sm:$0xff]  }
  0xc4   :  { %2156 = vmatprep.subr.bf16.mxu1 %v3754_v23  ;;  %v3801_v23 = vld [vmem:[#allocation6 + $0x620] ss:$16 sps:$4 sm:$0xff]  }
  0xc7   :  { %2157 = vmatpush1.bf16.msra.mxu1 %v3752_v24 }
  0xc8   :  { %2158 = vmatprep.subr.bf16.mxu1 %v3760_v25 }
  0xcb   :  { %2159 = vmatpush1.bf16.msra.mxu1 %v3758_v26  ;;  %v177_v26 = vsub.s32 7, %v4523_v44 }
  0xcc   :  { %2160 = vmatprep.subr.bf16.mxu1 %v3766_v27  ;;  %v3806_v27 = vld [vmem:[#allocation6 + $0x484] ss:$16 sps:$4 sm:$0xff]  }
  0xcf   :  { %2161 = vmatpush1.bf16.msra.mxu1 %v3764_v28  ;;  %v3809_v28 = vld [vmem:[#allocation6 + $0x644] ss:$16 sps:$4 sm:$0xff]  }
  0xd0   :  { %2162 = vmatprep.subr.bf16.mxu1 %v3772_v30 }
  0xd3   :  { %2163 = vmatpush1.bf16.msra.mxu1 %v3770_v32  ;;  %v3807_v32 = vld [vmem:[#allocation6 + $0x640] ss:$16 sps:$4 sm:$0xff]  }
  0xd4   :  { %2164 = vmatprep.subr.bf16.mxu1 %v3778_v34  ;;  %v178_v34 = vrot.slane %v4528_v46, %v177_v26  ;;  %v3857_v26 = vld [vmem:[#allocation6 + $0x744] ss:$16 sps:$4 sm:$0xff]  }
  0xd7   :  { %2165 = vmatpush1.bf16.msra.mxu1 %v3776_v36  ;;  %v3815_v36 = vld [vmem:[#allocation6 + $0x664] ss:$16 sps:$4 sm:$0xff]  }
  0xd8   :  { %2166 = vmatprep.subr.bf16.mxu1 %v3782_v38 }
  0xdb   :  { %2167 = vmatpush1.bf16.msra.mxu1 %v3780_v39  ;;  %v3810_v39 = vld [vmem:[#allocation6 + $0x4a0] ss:$16 sps:$4 sm:$0xff]  }
  0xdc   :  { %2168 = vmatprep.subr.bf16.mxu1 %v3788_v40  ;;  %v3813_v40 = vld [vmem:[#allocation6 + $0x660] ss:$16 sps:$4 sm:$0xff]  }
  0xdf   :  { %2169 = vmatpush1.bf16.msra.mxu1 %v3786_v41 }
  0xe0   :  { %2220 = vmatprep.subr.bf16.mxu1 %v3797_v42 }
 0x14d   :  { %v305_v50 = vpop.f32.mrb[0].mxu1 }
 0x14e   :  { %v306_v51 = vadd.f32 %v305_v50, %v150_v48  ;;  %v307_v52 = vpop.f32.mrb[1].mxu1  ;;  %v3821_v48 = vld [vmem:[#allocation6 + $0x684] ss:$16 sps:$4 sm:$0xff]  }
 0x14f   :  { %v308_v54 = vadd.f32 %v307_v52, %v154_v49  ;;  %v309_v55 = vpop.f32.mrb[2].mxu1  ;;  %v3819_v52 = vld [vmem:[#allocation6 + $0x680] ss:$16 sps:$4 sm:$0xff]  }
 0x150   :  { %v435_v57 = vmax.f32 %v306_v51, 0.0  ;;  %v310_v58 = vpop.f32.mrb[3].mxu1  ;;  %v3816_v51 = vld [vmem:[#allocation6 + $0x4c0] ss:$16 sps:$4 sm:$0xff]   ;;  %v3824_v55 = vld [vmem:[#allocation6 + $0x4e4] ss:$16 sps:$4 sm:$0xff]  }
 0x151   :  { %v436_v59 = vmax.f32 %v308_v54, 0.0 }
 0x152   :  { %v4547_v1 = vpack.c.bf16 %v435_v57, %v435_v57  ;;  %v3827_v57 = vld [vmem:[#allocation6 + $0x6a4] ss:$16 sps:$4 sm:$0xff]  }
 0x153   :  { %v4542_v61 = vpack.c.bf16 %v436_v59, %v436_v59 }
 0x155   :  { %v346_v3 = vpop.f32.mrb[4].mxu1  ;;  %2129 = vmatprep.mubr.bf16.mxu0 %v4542_v61 }
 0x156   :  { %v347_v4 = vadd.f32 %v346_v3, %v158_v60  ;;  %v348_v5 = vpop.f32.mrb[5].mxu1  ;;  %2130 = vmatmul.mubr.bf16.vlgmr.msra.gmra.mrb[0].mxu0 %v4547_v1  ;;  %v3822_v60 = vld [vmem:[#allocation6 + $0x4e0] ss:$16 sps:$4 sm:$0xff]   ;;  %v3833_v3 = vld [vmem:[#allocation6 + $0x6c4] ss:$16 sps:$4 sm:$0xff]  }
 0x157   :  { %v349_v6 = vadd.f32 %v348_v5, %v162_v63  ;;  %2180 = vmatpush1.bf16.msra.mxu0 %v3783_v62  ;;  %v350_v7 = vpop.f32.mrb[6].mxu1  ;;  %v3825_v62 = vld [vmem:[#allocation6 + $0x6a0] ss:$16 sps:$4 sm:$0xff]  }
 0x158   :  { %v437_v9 = vmax.f32 %v347_v4, 0.0  ;;  %v351_v10 = vpop.f32.mrb[7].mxu1  ;;  %2181 = vmatprep.subr.bf16.mxu0 %v3791_v2  ;;  %v3830_v2 = vld [vmem:[#allocation6 + $0x504] ss:$16 sps:$4 sm:$0xff]   ;;  %v3828_v5 = vld [vmem:[#allocation6 + $0x500] ss:$16 sps:$4 sm:$0xff]  }
 0x159   :  { %v438_v12 = vmax.f32 %v349_v6, 0.0  ;;  %v3831_v6 = vld [vmem:[#allocation6 + $0x6c0] ss:$16 sps:$4 sm:$0xff]   ;;  %v3836_v7 = vld [vmem:[#allocation6 + $0x524] ss:$16 sps:$4 sm:$0xff]  }
 0x15a   :  { %v4555_v17 = vpack.c.bf16 %v437_v9, %v437_v9  ;;  %v3834_v10 = vld [vmem:[#allocation6 + $0x520] ss:$16 sps:$4 sm:$0xff]  }
 0x15b   :  { %v4552_v13 = vpack.c.bf16 %v438_v12, %v438_v12  ;;  %2182 = vmatpush1.bf16.msra.mxu0 %v3789_v8  ;;  %v3839_v8 = vld [vmem:[#allocation6 + $0x6e4] ss:$16 sps:$4 sm:$0xff]  }
 0x15c   :  { %2183 = vmatprep.subr.bf16.mxu0 %v3794_v11  ;;  %v3837_v11 = vld [vmem:[#allocation6 + $0x6e0] ss:$16 sps:$4 sm:$0xff]  }
 0x15d   :  { %2170 = vmatprep.mubr.bf16.mxu1 %v4552_v13  ;;  %v4558_v20 = vpop.f32.mrb[8].mxu1 }
 0x15e   :  { %2171 = vmatmul.mubr.bf16.vlgmr.msra.gmra.mrb[24].mxu1 %v4555_v17  ;;  %v389_v21 = vpop.f32.mrb[9].mxu1 }
 0x15f   :  { %2184 = vmatpush1.bf16.msra.mxu0 %v3792_v14  ;;  %2221 = vmatpush1.bf16.msra.mxu1 %v3795_v15  ;;  %v390_v24 = vadd.f32 %v389_v21, %v170_v16  ;;  %v391_v25 = vpop.f32.mrb[10].mxu1  ;;  %v3842_v14 = vld [vmem:[#allocation6 + $0x544] ss:$16 sps:$4 sm:$0xff]  }
 0x160   :  { %2185 = vmatprep.subr.bf16.mxu0 %v3800_v18  ;;  %2222 = vmatprep.subr.bf16.mxu1 %v3803_v19  ;;  %v392_v29 = vpop.f32.mrb[11].mxu1  ;;  %v3845_v15 = vld [vmem:[#allocation6 + $0x704] ss:$16 sps:$4 sm:$0xff]   ;;  %v3840_v18 = vld [vmem:[#allocation6 + $0x540] ss:$16 sps:$4 sm:$0xff]  }
 0x161   :  { %v440_v30 = vmax.f32 %v390_v24, 0.0  ;;  %v3843_v19 = vld [vmem:[#allocation6 + $0x700] ss:$16 sps:$4 sm:$0xff]   ;;  %v3848_v21 = vld [vmem:[#allocation6 + $0x564] ss:$16 sps:$4 sm:$0xff]  }
 0x162   :  { %v3849_v24 = vld [vmem:[#allocation6 + $0x720] ss:$16 sps:$4 sm:$0xff]   ;;  %v3854_v25 = vld [vmem:[#allocation6 + $0x584] ss:$16 sps:$4 sm:$0xff]  }
 0x163   :  { %2186 = vmatpush1.bf16.msra.mxu0 %v3798_v22  ;;  %2223 = vmatpush1.bf16.msra.mxu1 %v3801_v23  ;;  %v4562_v33 = vpack.c.bf16 %v440_v30, %v440_v30  ;;  %v3851_v22 = vld [vmem:[#allocation6 + $0x724] ss:$16 sps:$4 sm:$0xff]   ;;  %v3846_v23 = vld [vmem:[#allocation6 + $0x560] ss:$16 sps:$4 sm:$0xff]  }
 0x164   :  { %2187 = vmatprep.subr.bf16.mxu0 %v3806_v27  ;;  %2224 = vmatprep.subr.bf16.mxu1 %v3809_v28  ;;  %v165_v27 = vsub.s32 4, %v4523_v44  ;;  %v3852_v28 = vld [vmem:[#allocation6 + $0x580] ss:$16 sps:$4 sm:$0xff]   ;;  %v3860_v30 = vld [vmem:[#allocation6 + $0x5a4] ss:$16 sps:$4 sm:$0xff]  }
 0x165   :  { %v4565_v37 = vpop.f32.mrb[12].mxu1  ;;  %2211 = vmatprep.mubr.bf16.mxu0 %v4562_v33  ;;  %v3855_v29 = vld [vmem:[#allocation6 + $0x740] ss:$16 sps:$4 sm:$0xff]  }
 0x166   :  { %v430_v38 = vpop.f32.mrb[13].mxu1 }
 0x167   :  { %2188 = vmatpush1.bf16.msra.mxu0 %v3804_v31  ;;  %2225 = vmatpush1.bf16.msra.mxu1 %v3807_v32  ;;  %v431_v41 = vadd.f32 %v430_v38, %v178_v34  ;;  %v432_v42 = vpop.f32.mrb[14].mxu1  ;;  %v3863_v31 = vld [vmem:[#allocation6 + $0x764] ss:$16 sps:$4 sm:$0xff]   ;;  %v166_v32 = vrot.slane %v4528_v46, %v165_v27  ;;  %v3858_v34 = vld [vmem:[#allocation6 + $0x5a0] ss:$16 sps:$4 sm:$0xff]  }
 0x168   :  { %2189 = vmatprep.subr.bf16.mxu0 %v3812_v35  ;;  %2226 = vmatprep.subr.bf16.mxu1 %v3815_v36  ;;  %v433_v49 = vpop.f32.mrb[15].mxu1  ;;  %v3861_v35 = vld [vmem:[#allocation6 + $0x760] ss:$16 sps:$4 sm:$0xff]   ;;  %v3866_v36 = vld [vmem:[#allocation6 + $0x5c4] ss:$16 sps:$4 sm:$0xff]  }
 0x169   :  { %v442_v50 = vmax.f32 %v431_v41, 0.0  ;;  %v3869_v38 = vld [vmem:[#allocation6 + $0x784] ss:$16 sps:$4 sm:$0xff]   ;;  %v3864_v41 = vld [vmem:[#allocation6 + $0x5c0] ss:$16 sps:$4 sm:$0xff]  }
 0x16a   :  { %v3867_v42 = vld [vmem:[#allocation6 + $0x780] ss:$16 sps:$4 sm:$0xff]   ;;  %v3915_v27 = vld [vmem:[#allocation6 + $0x288] ss:$16 sps:$4 sm:$0xff]  }
 0x16b   :  { %2190 = vmatpush1.bf16.msra.mxu0 %v3810_v39  ;;  %2227 = vmatpush1.bf16.msra.mxu1 %v3813_v40  ;;  %v4568_v54 = vpack.c.bf16 %v442_v50, %v442_v50  ;;  %v388_v39 = vadd.f32 %v4558_v20, %v166_v32  ;;  %v173_v40 = vsub.s32 6, %v4523_v44  ;;  %v3878_v20 = vld [vmem:[#allocation6 + $0x7c4] ss:$16 sps:$4 sm:$0xff]   ;;  %v3926_v32 = vld [vmem:[#allocation6 + $0x10c] ss:$16 sps:$4 sm:$0xff]  }
 0x16c   :  { %2191 = vmatprep.subr.bf16.mxu0 %v3818_v43  ;;  %2228 = vmatprep.subr.bf16.mxu1 %v3821_v48  ;;  %v3872_v43 = vld [vmem:[#allocation6 + $0x5e4] ss:$16 sps:$4 sm:$0xff]   ;;  %v4184_v44 = vld [vmem:[#allocation10 + $0x78] sm:$0xff]  }
 0x16d   :  { %2252 = vmatprep.mubr.bf16.mxu1 %v4568_v54  ;;  %v4571_v58 = vpop.f32.mrb[16].mxu1  ;;  %v3875_v48 = vld [vmem:[#allocation6 + $0x7a4] ss:$16 sps:$4 sm:$0xff]   ;;  %v439_v49 = vmax.f32 %v388_v39, 0.0  ;;  %v174_v50 = vrot.slane %v4528_v46, %v173_v40  ;;  %v3887_v46 = vld [vmem:[#allocation6 + $0x2c] ss:$16 sps:$4 sm:$0xff]  }
 0x16e   :  { %v4573_v59 = vpop.f32.mrb[17].mxu1  ;;  %v3935_v39 = vld [vmem:[#allocation6 + $0x2ec] ss:$16 sps:$4 sm:$0xff]   ;;  %v3930_v40 = vld [vmem:[#allocation6 + $0x128] ss:$16 sps:$4 sm:$0xff]  }
 0x16f   :  { %2192 = vmatpush1.bf16.msra.mxu0 %v3816_v51  ;;  %2229 = vmatpush1.bf16.msra.mxu1 %v3819_v52  ;;  %v773_v63 = vpop.f32.mrb[18].mxu1  ;;  %v3870_v51 = vld [vmem:[#allocation6 + $0x5e0] ss:$16 sps:$4 sm:$0xff]  }
 0x170   :  { %2193 = vmatprep.subr.bf16.mxu0 %v3824_v55  ;;  %2230 = vmatprep.subr.bf16.mxu1 %v3827_v57  ;;  %v774_v4 = vpop.f32.mrb[19].mxu1  ;;  %v3873_v52 = vld [vmem:[#allocation6 + $0x7a0] ss:$16 sps:$4 sm:$0xff]   ;;  %v3881_v55 = vld [vmem:[#allocation6 + $0xc] ss:$16 sps:$4 sm:$0xff]   ;;  %v4584_v57 = vpack.c.bf16 %v439_v49, %v439_v49 }
 0x171   :  { %v3879_v63 = vld [vmem:[#allocation6 + $0x8] ss:$16 sps:$4 sm:$0xff]   ;;  %v3882_v4 = vld [vmem:[#allocation6 + $0x7e0] ss:$16 sps:$4 sm:$0xff]  }
 0x172   :  { %v3939_v49 = vld [vmem:[#allocation6 + $0x308] ss:$16 sps:$4 sm:$0xff]  }
 0x173   :  { %2194 = vmatpush1.bf16.msra.mxu0 %v3822_v60  ;;  %2231 = vmatpush1.bf16.msra.mxu1 %v3825_v62  ;;  %v429_v60 = vadd.f32 %v4565_v37, %v174_v50  ;;  %v3876_v62 = vld [vmem:[#allocation6 + $0x7c0] ss:$16 sps:$4 sm:$0xff]   ;;  %v3893_v37 = vld [vmem:[#allocation6 + $0x20c] ss:$16 sps:$4 sm:$0xff]  }
 0x174   :  { %2195 = vmatprep.subr.bf16.mxu0 %v3830_v2  ;;  %2232 = vmatprep.subr.bf16.mxu1 %v3833_v3  ;;  %v3884_v2 = vld [vmem:[#allocation6 + $0x7e4] ss:$16 sps:$4 sm:$0xff]   ;;  %v3944_v50 = vld [vmem:[#allocation6 + $0x16c] ss:$16 sps:$4 sm:$0xff]  }
 0x175   :  { %v4575_v0 = vpop.f32.mrb[20].mxu1  ;;  %v441_v3 = vmax.f32 %v429_v60, 0.0  ;;  %v3953_v60 = vld [vmem:[#allocation6 + $0x34c] ss:$16 sps:$4 sm:$0xff]  }
 0x176   :  { %v4577_v9 = vpop.f32.mrb[21].mxu1 }
 0x177   :  { %2196 = vmatpush1.bf16.msra.mxu0 %v3828_v5  ;;  %2233 = vmatpush1.bf16.msra.mxu1 %v3831_v6  ;;  %v814_v12 = vpop.f32.mrb[22].mxu1  ;;  %v3885_v5 = vld [vmem:[#allocation6 + $0x28] ss:$16 sps:$4 sm:$0xff]   ;;  %v3890_v6 = vld [vmem:[#allocation6 + $0x4c] ss:$16 sps:$4 sm:$0xff]  }
 0x178   :  { %2197 = vmatprep.subr.bf16.mxu0 %v3836_v7  ;;  %2234 = vmatprep.subr.bf16.mxu1 %v3839_v8  ;;  %v815_v16 = vpop.f32.mrb[23].mxu1  ;;  %v4589_v7 = vpack.c.bf16 %v441_v3, %v441_v3  ;;  %v3888_v8 = vld [vmem:[#allocation6 + $0x48] ss:$16 sps:$4 sm:$0xff]   ;;  %v3899_v12 = vld [vmem:[#allocation6 + $0x22c] ss:$16 sps:$4 sm:$0xff]  }
 0x179   :  { %v3905_v16 = vld [vmem:[#allocation6 + $0x24c] ss:$16 sps:$4 sm:$0xff]   ;;  %v3954_v3 = vld [vmem:[#allocation6 + $0x1a8] ss:$16 sps:$4 sm:$0xff]  }
 0x17b   :  { %2198 = vmatpush1.bf16.msra.mxu0 %v3834_v10  ;;  %2235 = vmatpush1.bf16.msra.mxu1 %v3837_v11  ;;  %v3891_v10 = vld [vmem:[#allocation6 + $0x208] ss:$16 sps:$4 sm:$0xff]   ;;  %v3896_v11 = vld [vmem:[#allocation6 + $0x6c] ss:$16 sps:$4 sm:$0xff]  }
 0x17c   :  { %2199 = vmatprep.subr.bf16.mxu0 %v3842_v14  ;;  %2236 = vmatprep.subr.bf16.mxu1 %v3845_v15  ;;  %v3894_v14 = vld [vmem:[#allocation6 + $0x68] ss:$16 sps:$4 sm:$0xff]   ;;  %v3902_v15 = vld [vmem:[#allocation6 + $0x8c] ss:$16 sps:$4 sm:$0xff]  }
 0x17f   :  { %2200 = vmatpush1.bf16.msra.mxu0 %v3840_v18  ;;  %2237 = vmatpush1.bf16.msra.mxu1 %v3843_v19  ;;  %v3900_v18 = vld [vmem:[#allocation6 + $0x88] ss:$16 sps:$4 sm:$0xff]  }
 0x180   :  { %2201 = vmatprep.subr.bf16.mxu0 %v3848_v21  ;;  %2238 = vmatprep.subr.bf16.mxu1 %v3851_v22  ;;  %v3903_v19 = vld [vmem:[#allocation6 + $0x248] ss:$16 sps:$4 sm:$0xff]   ;;  %v3908_v21 = vld [vmem:[#allocation6 + $0xac] ss:$16 sps:$4 sm:$0xff]  }
 0x181   :  { %v3911_v22 = vld [vmem:[#allocation6 + $0x26c] ss:$16 sps:$4 sm:$0xff]  }
 0x183   :  { %2202 = vmatpush1.bf16.msra.mxu0 %v3846_v23  ;;  %2239 = vmatpush1.bf16.msra.mxu1 %v3849_v24  ;;  %v3906_v23 = vld [vmem:[#allocation6 + $0xa8] ss:$16 sps:$4 sm:$0xff]  }
 0x184   :  { %2203 = vmatprep.subr.bf16.mxu0 %v3854_v25  ;;  %2240 = vmatprep.subr.bf16.mxu1 %v3857_v26  ;;  %v3909_v24 = vld [vmem:[#allocation6 + $0x268] ss:$16 sps:$4 sm:$0xff]   ;;  %v3914_v25 = vld [vmem:[#allocation6 + $0xcc] ss:$16 sps:$4 sm:$0xff]  }
 0x185   :  { %v3912_v26 = vld [vmem:[#allocation6 + $0xc8] ss:$16 sps:$4 sm:$0xff]  }
 0x187   :  { %2204 = vmatpush1.bf16.msra.mxu0 %v3852_v28  ;;  %2241 = vmatpush1.bf16.msra.mxu1 %v3855_v29  ;;  %v3920_v28 = vld [vmem:[#allocation6 + $0xec] ss:$16 sps:$4 sm:$0xff]  }
 0x188   :  { %2205 = vmatprep.subr.bf16.mxu0 %v3860_v30  ;;  %2242 = vmatprep.subr.bf16.mxu1 %v3863_v31  ;;  %v3923_v29 = vld [vmem:[#allocation6 + $0x2ac] ss:$16 sps:$4 sm:$0xff]   ;;  %v3918_v30 = vld [vmem:[#allocation6 + $0xe8] ss:$16 sps:$4 sm:$0xff]  }
 0x189   :  { %v3921_v31 = vld [vmem:[#allocation6 + $0x2a8] ss:$16 sps:$4 sm:$0xff]  }
 0x18b   :  { %2206 = vmatpush1.bf16.msra.mxu0 %v3858_v34  ;;  %2243 = vmatpush1.bf16.msra.mxu1 %v3861_v35  ;;  %v3929_v34 = vld [vmem:[#allocation6 + $0x2cc] ss:$16 sps:$4 sm:$0xff]   ;;  %v3924_v35 = vld [vmem:[#allocation6 + $0x108] ss:$16 sps:$4 sm:$0xff]  }
 0x18c   :  { %2207 = vmatprep.subr.bf16.mxu0 %v3866_v36  ;;  %2244 = vmatprep.subr.bf16.mxu1 %v3869_v38  ;;  %v3927_v36 = vld [vmem:[#allocation6 + $0x2c8] ss:$16 sps:$4 sm:$0xff]   ;;  %v3932_v38 = vld [vmem:[#allocation6 + $0x12c] ss:$16 sps:$4 sm:$0xff]  }
 0x18f   :  { %2208 = vmatpush1.bf16.msra.mxu0 %v3864_v41  ;;  %2245 = vmatpush1.bf16.msra.mxu1 %v3867_v42  ;;  %v3933_v41 = vld [vmem:[#allocation6 + $0x2e8] ss:$16 sps:$4 sm:$0xff]   ;;  %v3938_v42 = vld [vmem:[#allocation6 + $0x14c] ss:$16 sps:$4 sm:$0xff]  }
 0x190   :  { %2209 = vmatprep.subr.bf16.mxu0 %v3872_v43  ;;  %2246 = vmatprep.subr.bf16.mxu1 %v3875_v48  ;;  %v3941_v43 = vld [vmem:[#allocation6 + $0x30c] ss:$16 sps:$4 sm:$0xff]   ;;  %v3936_v48 = vld [vmem:[#allocation6 + $0x148] ss:$16 sps:$4 sm:$0xff]  }
 0x193   :  { %2210 = vmatpush1.bf16.msra.mxu0 %v3870_v51  ;;  %2247 = vmatpush1.bf16.msra.mxu1 %v3873_v52  ;;  %v3947_v51 = vld [vmem:[#allocation6 + $0x32c] ss:$16 sps:$4 sm:$0xff]   ;;  %v3942_v52 = vld [vmem:[#allocation6 + $0x168] ss:$16 sps:$4 sm:$0xff]  }
 0x194   :  { %2248 = vmatprep.subr.bf16.mxu1 %v3878_v20  ;;  %2261 = vmatprep.subr.bf16.mxu0 %v3881_v55  ;;  %v3945_v20 = vld [vmem:[#allocation6 + $0x328] ss:$16 sps:$4 sm:$0xff]   ;;  %v3950_v55 = vld [vmem:[#allocation6 + $0x18c] ss:$16 sps:$4 sm:$0xff]  }
 0x196   :  { %2212 = vmatmul.mubr.bf16.vlgmr.msra.gmra.mrb[4].mxu0 %v4584_v57 }
 0x197   :  { %2249 = vmatpush1.bf16.msra.mxu1 %v3876_v62  ;;  %2262 = vmatpush1.bf16.msra.mxu0 %v3879_v63  ;;  %v3948_v62 = vld [vmem:[#allocation6 + $0x188] ss:$16 sps:$4 sm:$0xff]  }
 0x198   :  { %2293 = vmatprep.mubr.bf16.mxu0 %v4542_v61  ;;  %2250 = vmatprep.subr.bf16.mxu1 %v3884_v2  ;;  %v3897_v61 = vld [vmem:[#allocation6 + $0x228] ss:$16 sps:$4 sm:$0xff]   ;;  %v3956_v2 = vld [vmem:[#allocation6 + $0x1ac] ss:$16 sps:$4 sm:$0xff]  }
 0x199   :  { %2263 = vmatprep.subr.bf16.mxu0 %v3887_v46  ;;  %v3951_v63 = vld [vmem:[#allocation6 + $0x348] ss:$16 sps:$4 sm:$0xff]   ;;  %v3959_v46 = vld [vmem:[#allocation6 + $0x36c] ss:$16 sps:$4 sm:$0xff]  }
 0x19b   :  { %2251 = vmatpush1.bf16.msra.mxu1 %v3882_v4  ;;  %2264 = vmatpush1.bf16.msra.mxu0 %v3885_v5  ;;  %v3957_v4 = vld [vmem:[#allocation6 + $0x368] ss:$16 sps:$4 sm:$0xff]   ;;  %v3962_v5 = vld [vmem:[#allocation6 + $0x1cc] ss:$16 sps:$4 sm:$0xff]  }
 0x19c   :  { %2265 = vmatprep.subr.bf16.mxu0 %v3890_v6  ;;  %2302 = vmatprep.subr.bf16.mxu1 %v3893_v37  ;;  %v3965_v6 = vld [vmem:[#allocation6 + $0x38c] ss:$16 sps:$4 sm:$0xff]   ;;  %v3960_v37 = vld [vmem:[#allocation6 + $0x1c8] ss:$16 sps:$4 sm:$0xff]  }
 0x19e   :  { %2253 = vmatmul.mubr.bf16.vlgmr.msra.gmra.mrb[28].mxu1 %v4589_v7 }
 0x19f   :  { %2266 = vmatpush1.bf16.msra.mxu0 %v3888_v8  ;;  %2303 = vmatpush1.bf16.msra.mxu1 %v3891_v10  ;;  %v3963_v8 = vld [vmem:[#allocation6 + $0x388] ss:$16 sps:$4 sm:$0xff]   ;;  %v3968_v10 = vld [vmem:[#allocation6 + $0x1ec] ss:$16 sps:$4 sm:$0xff]  }
 0x1a0   :  { %2334 = vmatprep.mubr.bf16.mxu1 %v4552_v13  ;;  %2267 = vmatprep.subr.bf16.mxu0 %v3896_v11  ;;  %v3917_v13 = vld [vmem:[#allocation6 + $0x28c] ss:$16 sps:$4 sm:$0xff]  }
 0x1a1   :  { %2304 = vmatprep.subr.bf16.mxu1 %v3899_v12  ;;  %v3971_v11 = vld [vmem:[#allocation6 + $0x3ac] ss:$16 sps:$4 sm:$0xff]   ;;  %v3966_v12 = vld [vmem:[#allocation6 + $0x1e8] ss:$16 sps:$4 sm:$0xff]  }
 0x1a3   :  { %2268 = vmatpush1.bf16.msra.mxu0 %v3894_v14  ;;  %2305 = vmatpush1.bf16.msra.mxu1 %v3897_v61  ;;  %v3969_v14 = vld [vmem:[#allocation6 + $0x3a8] ss:$16 sps:$4 sm:$0xff]   ;;  %v3974_v61 = vld [vmem:[#allocation6 + $0x3cc] ss:$16 sps:$4 sm:$0xff]  }
 0x1a4   :  { %2269 = vmatprep.subr.bf16.mxu0 %v3902_v15  ;;  %2306 = vmatprep.subr.bf16.mxu1 %v3905_v16  ;;  %v3977_v15 = vld [vmem:[#allocation6 + $0x40c] ss:$16 sps:$4 sm:$0xff]   ;;  %v3972_v16 = vld [vmem:[#allocation6 + $0x3c8] ss:$16 sps:$4 sm:$0xff]  }
 0x1a7   :  { %2270 = vmatpush1.bf16.msra.mxu0 %v3900_v18  ;;  %2307 = vmatpush1.bf16.msra.mxu1 %v3903_v19  ;;  %v3975_v18 = vld [vmem:[#allocation6 + $0x408] ss:$16 sps:$4 sm:$0xff]   ;;  %v3980_v19 = vld [vmem:[#allocation6 + $0x3ec] ss:$16 sps:$4 sm:$0xff]  }
 0x1a8   :  { %2271 = vmatprep.subr.bf16.mxu0 %v3908_v21  ;;  %2308 = vmatprep.subr.bf16.mxu1 %v3911_v22  ;;  %v3983_v21 = vld [vmem:[#allocation6 + $0x42c] ss:$16 sps:$4 sm:$0xff]   ;;  %v3978_v22 = vld [vmem:[#allocation6 + $0x3e8] ss:$16 sps:$4 sm:$0xff]  }
 0x1ab   :  { %2272 = vmatpush1.bf16.msra.mxu0 %v3906_v23  ;;  %2309 = vmatpush1.bf16.msra.mxu1 %v3909_v24  ;;  %v3981_v23 = vld [vmem:[#allocation6 + $0x428] ss:$16 sps:$4 sm:$0xff]   ;;  %v3986_v24 = vld [vmem:[#allocation6 + $0x44c] ss:$16 sps:$4 sm:$0xff]  }
 0x1ac   :  { %2273 = vmatprep.subr.bf16.mxu0 %v3914_v25  ;;  %2310 = vmatprep.subr.bf16.mxu1 %v3917_v13  ;;  %v3989_v25 = vld [vmem:[#allocation6 + $0x60c] ss:$16 sps:$4 sm:$0xff]   ;;  %v3984_v13 = vld [vmem:[#allocation6 + $0x448] ss:$16 sps:$4 sm:$0xff]  }
 0x1af   :  { %2274 = vmatpush1.bf16.msra.mxu0 %v3912_v26  ;;  %2311 = vmatpush1.bf16.msra.mxu1 %v3915_v27  ;;  %v3987_v26 = vld [vmem:[#allocation6 + $0x608] ss:$16 sps:$4 sm:$0xff]   ;;  %v3992_v27 = vld [vmem:[#allocation6 + $0x46c] ss:$16 sps:$4 sm:$0xff]  }
 0x1b0   :  { %2275 = vmatprep.subr.bf16.mxu0 %v3920_v28  ;;  %2312 = vmatprep.subr.bf16.mxu1 %v3923_v29  ;;  %v3995_v28 = vld [vmem:[#allocation6 + $0x62c] ss:$16 sps:$4 sm:$0xff]   ;;  %v3993_v29 = vld [vmem:[#allocation6 + $0x628] ss:$16 sps:$4 sm:$0xff]  }
 0x1b3   :  { %2276 = vmatpush1.bf16.msra.mxu0 %v3918_v30  ;;  %2313 = vmatpush1.bf16.msra.mxu1 %v3921_v31  ;;  %v4001_v30 = vld [vmem:[#allocation6 + $0x64c] ss:$16 sps:$4 sm:$0xff]   ;;  %v3996_v31 = vld [vmem:[#allocation6 + $0x488] ss:$16 sps:$4 sm:$0xff]  }
 0x1b4   :  { %2277 = vmatprep.subr.bf16.mxu0 %v3926_v32  ;;  %2314 = vmatprep.subr.bf16.mxu1 %v3929_v34  ;;  %v3999_v32 = vld [vmem:[#allocation6 + $0x648] ss:$16 sps:$4 sm:$0xff]   ;;  %v4004_v34 = vld [vmem:[#allocation6 + $0x4ac] ss:$16 sps:$4 sm:$0xff]  }
 0x1b7   :  { %2278 = vmatpush1.bf16.msra.mxu0 %v3924_v35  ;;  %2315 = vmatpush1.bf16.msra.mxu1 %v3927_v36  ;;  %v4007_v35 = vld [vmem:[#allocation6 + $0x66c] ss:$16 sps:$4 sm:$0xff]   ;;  %v4005_v36 = vld [vmem:[#allocation6 + $0x668] ss:$16 sps:$4 sm:$0xff]  }
 0x1b8   :  { %2279 = vmatprep.subr.bf16.mxu0 %v3932_v38  ;;  %2316 = vmatprep.subr.bf16.mxu1 %v3935_v39  ;;  %v4010_v38 = vld [vmem:[#allocation6 + $0x4cc] ss:$16 sps:$4 sm:$0xff]   ;;  %v4008_v39 = vld [vmem:[#allocation6 + $0x4c8] ss:$16 sps:$4 sm:$0xff]  }
 0x1bb   :  { %2280 = vmatpush1.bf16.msra.mxu0 %v3930_v40  ;;  %2317 = vmatpush1.bf16.msra.mxu1 %v3933_v41  ;;  %v4011_v40 = vld [vmem:[#allocation6 + $0x688] ss:$16 sps:$4 sm:$0xff]   ;;  %v4016_v41 = vld [vmem:[#allocation6 + $0x4ec] ss:$16 sps:$4 sm:$0xff]  }
 0x1bc   :  { %2281 = vmatprep.subr.bf16.mxu0 %v3938_v42  ;;  %2318 = vmatprep.subr.bf16.mxu1 %v3941_v43  ;;  %v4019_v42 = vld [vmem:[#allocation6 + $0x6ac] ss:$16 sps:$4 sm:$0xff]   ;;  %v4014_v43 = vld [vmem:[#allocation6 + $0x4e8] ss:$16 sps:$4 sm:$0xff]  }
 0x1bf   :  { %2282 = vmatpush1.bf16.msra.mxu0 %v3936_v48  ;;  %2319 = vmatpush1.bf16.msra.mxu1 %v3939_v49  ;;  %v4017_v48 = vld [vmem:[#allocation6 + $0x6a8] ss:$16 sps:$4 sm:$0xff]   ;;  %v4022_v49 = vld [vmem:[#allocation6 + $0x50c] ss:$16 sps:$4 sm:$0xff]  }
 0x1c0   :  { %2283 = vmatprep.subr.bf16.mxu0 %v3944_v50  ;;  %2320 = vmatprep.subr.bf16.mxu1 %v3947_v51  ;;  %v4025_v50 = vld [vmem:[#allocation6 + $0x6cc] ss:$16 sps:$4 sm:$0xff]   ;;  %v4020_v51 = vld [vmem:[#allocation6 + $0x508] ss:$16 sps:$4 sm:$0xff]  }
 0x1c3   :  { %2284 = vmatpush1.bf16.msra.mxu0 %v3942_v52  ;;  %2321 = vmatpush1.bf16.msra.mxu1 %v3945_v20  ;;  %v4023_v52 = vld [vmem:[#allocation6 + $0x6c8] ss:$16 sps:$4 sm:$0xff]   ;;  %v4028_v20 = vld [vmem:[#allocation6 + $0x52c] ss:$16 sps:$4 sm:$0xff]  }
 0x1c4   :  { %2285 = vmatprep.subr.bf16.mxu0 %v3950_v55  ;;  %2322 = vmatprep.subr.bf16.mxu1 %v3953_v60  ;;  %v4031_v55 = vld [vmem:[#allocation6 + $0x6ec] ss:$16 sps:$4 sm:$0xff]   ;;  %v4026_v60 = vld [vmem:[#allocation6 + $0x528] ss:$16 sps:$4 sm:$0xff]  }
 0x1c7   :  { %2286 = vmatpush1.bf16.msra.mxu0 %v3948_v62  ;;  %2323 = vmatpush1.bf16.msra.mxu1 %v3951_v63  ;;  %v4029_v62 = vld [vmem:[#allocation6 + $0x6e8] ss:$16 sps:$4 sm:$0xff]   ;;  %v4034_v63 = vld [vmem:[#allocation6 + $0x54c] ss:$16 sps:$4 sm:$0xff]  }
 0x1c8   :  { %2287 = vmatprep.subr.bf16.mxu0 %v3956_v2  ;;  %2324 = vmatprep.subr.bf16.mxu1 %v3959_v46  ;;  %v4037_v2 = vld [vmem:[#allocation6 + $0x70c] ss:$16 sps:$4 sm:$0xff]   ;;  %v4032_v46 = vld [vmem:[#allocation6 + $0x548] ss:$16 sps:$4 sm:$0xff]  }
 0x1cb   :  { %2288 = vmatpush1.bf16.msra.mxu0 %v3954_v3  ;;  %2325 = vmatpush1.bf16.msra.mxu1 %v3957_v4  ;;  %v4035_v3 = vld [vmem:[#allocation6 + $0x708] ss:$16 sps:$4 sm:$0xff]   ;;  %v4040_v4 = vld [vmem:[#allocation6 + $0x56c] ss:$16 sps:$4 sm:$0xff]  }
 0x1cc   :  { %2289 = vmatprep.subr.bf16.mxu0 %v3962_v5  ;;  %2326 = vmatprep.subr.bf16.mxu1 %v3965_v6  ;;  %v4043_v5 = vld [vmem:[#allocation6 + $0x72c] ss:$16 sps:$4 sm:$0xff]   ;;  %v4038_v6 = vld [vmem:[#allocation6 + $0x568] ss:$16 sps:$4 sm:$0xff]  }
 0x1cf   :  { %2290 = vmatpush1.bf16.msra.mxu0 %v3960_v37  ;;  %2327 = vmatpush1.bf16.msra.mxu1 %v3963_v8  ;;  %v4041_v37 = vld [vmem:[#allocation6 + $0x728] ss:$16 sps:$4 sm:$0xff]   ;;  %v4046_v8 = vld [vmem:[#allocation6 + $0x58c] ss:$16 sps:$4 sm:$0xff]  }
 0x1d0   :  { %2291 = vmatprep.subr.bf16.mxu0 %v3968_v10  ;;  %2328 = vmatprep.subr.bf16.mxu1 %v3971_v11  ;;  %v4049_v10 = vld [vmem:[#allocation6 + $0x74c] ss:$16 sps:$4 sm:$0xff]   ;;  %v4044_v11 = vld [vmem:[#allocation6 + $0x588] ss:$16 sps:$4 sm:$0xff]  }
 0x1d3   :  { %2292 = vmatpush1.bf16.msra.mxu0 %v3966_v12  ;;  %2329 = vmatpush1.bf16.msra.mxu1 %v3969_v14  ;;  %v4047_v12 = vld [vmem:[#allocation6 + $0x748] ss:$16 sps:$4 sm:$0xff]   ;;  %v4052_v14 = vld [vmem:[#allocation6 + $0x5ac] ss:$16 sps:$4 sm:$0xff]  }
 0x1d4   :  { %2330 = vmatprep.subr.bf16.mxu1 %v3974_v61  ;;  %2343 = vmatprep.subr.bf16.mxu0 %v3977_v15  ;;  %v4055_v61 = vld [vmem:[#allocation6 + $0x76c] ss:$16 sps:$4 sm:$0xff]   ;;  %v4050_v15 = vld [vmem:[#allocation6 + $0x5a8] ss:$16 sps:$4 sm:$0xff]  }
 0x1d6   :  { %2294 = vmatmul.mubr.bf16.vlgmr.msra.gmra.mrb[8].mxu0 %v4547_v1  ;;  %v3990_v1 = vld [vmem:[#allocation6 + $0x468] ss:$16 sps:$4 sm:$0xff]  }
 0x1d7   :  { %2331 = vmatpush1.bf16.msra.mxu1 %v3972_v16  ;;  %2344 = vmatpush1.bf16.msra.mxu0 %v3975_v18  ;;  %v4053_v16 = vld [vmem:[#allocation6 + $0x768] ss:$16 sps:$4 sm:$0xff]   ;;  %v4058_v18 = vld [vmem:[#allocation6 + $0x5cc] ss:$16 sps:$4 sm:$0xff]  }
 0x1d8   :  { %2375 = vmatprep.mubr.bf16.mxu0 %v4562_v33  ;;  %2332 = vmatprep.subr.bf16.mxu1 %v3980_v19  ;;  %v3998_v33 = vld [vmem:[#allocation6 + $0x48c] ss:$16 sps:$4 sm:$0xff]  }
 0x1d9   :  { %2345 = vmatprep.subr.bf16.mxu0 %v3983_v21  ;;  %v4061_v19 = vld [vmem:[#allocation6 + $0x78c] ss:$16 sps:$4 sm:$0xff]   ;;  %v4056_v21 = vld [vmem:[#allocation6 + $0x5c8] ss:$16 sps:$4 sm:$0xff]  }
 0x1db   :  { %2333 = vmatpush1.bf16.msra.mxu1 %v3978_v22  ;;  %2346 = vmatpush1.bf16.msra.mxu0 %v3981_v23  ;;  %v4059_v22 = vld [vmem:[#allocation6 + $0x788] ss:$16 sps:$4 sm:$0xff]   ;;  %v4064_v23 = vld [vmem:[#allocation6 + $0x5ec] ss:$16 sps:$4 sm:$0xff]  }
 0x1dc   :  { %2347 = vmatprep.subr.bf16.mxu0 %v3986_v24  ;;  %2384 = vmatprep.subr.bf16.mxu1 %v3989_v25  ;;  %v4067_v24 = vld [vmem:[#allocation6 + $0x7ac] ss:$16 sps:$4 sm:$0xff]   ;;  %v4062_v25 = vld [vmem:[#allocation6 + $0x5e8] ss:$16 sps:$4 sm:$0xff]  }
 0x1de   :  { %2335 = vmatmul.mubr.bf16.vlgmr.msra.gmra.mrb[32].mxu1 %v4555_v17  ;;  %v4002_v17 = vld [vmem:[#allocation6 + $0x4a8] ss:$16 sps:$4 sm:$0xff]  }
 0x1df   :  { %2348 = vmatpush1.bf16.msra.mxu0 %v3984_v13  ;;  %2385 = vmatpush1.bf16.msra.mxu1 %v3987_v26  ;;  %v4065_v13 = vld [vmem:[#allocation6 + $0x7a8] ss:$16 sps:$4 sm:$0xff]   ;;  %v4070_v26 = vld [vmem:[#allocation6 + $0x7cc] ss:$16 sps:$4 sm:$0xff]  }
 0x1e0   :  { %2416 = vmatprep.mubr.bf16.mxu1 %v4568_v54  ;;  %2349 = vmatprep.subr.bf16.mxu0 %v3992_v27  ;;  %v4013_v54 = vld [vmem:[#allocation6 + $0x68c] ss:$16 sps:$4 sm:$0xff]  }
 0x1e1   :  { %2386 = vmatprep.subr.bf16.mxu1 %v3995_v28  ;;  %v4076_v27 = vld [vmem:[#allocation9 + $0x4] ss:$8 sps:$4 sm:$0xff]   ;;  %v4068_v28 = vld [vmem:[#allocation6 + $0x7c8] ss:$16 sps:$4 sm:$0xff]  }
 0x1e3   :  { %2350 = vmatpush1.bf16.msra.mxu0 %v3990_v1  ;;  %2387 = vmatpush1.bf16.msra.mxu1 %v3993_v29  ;;  %v4074_v1 = vld [vmem:[#allocation9] ss:$8 sps:$4 sm:$0xff]   ;;  %v4073_v29 = vld [vmem:[#allocation6 + $0x7ec] ss:$16 sps:$4 sm:$0xff]  }
 0x1e4   :  { %2351 = vmatprep.subr.bf16.mxu0 %v3998_v33  ;;  %2388 = vmatprep.subr.bf16.mxu1 %v4001_v30  ;;  %v4079_v33 = vld [vmem:[#allocation9 + $0x14] ss:$8 sps:$4 sm:$0xff]   ;;  %v4071_v30 = vld [vmem:[#allocation6 + $0x7e8] ss:$16 sps:$4 sm:$0xff]  }
 0x1e7   :  { %2352 = vmatpush1.bf16.msra.mxu0 %v3996_v31  ;;  %2389 = vmatpush1.bf16.msra.mxu1 %v3999_v32  ;;  %v4077_v31 = vld [vmem:[#allocation9 + $0x10] ss:$8 sps:$4 sm:$0xff]   ;;  %v4082_v32 = vld [vmem:[#allocation9 + $0x24] ss:$8 sps:$4 sm:$0xff]  }
 0x1e8   :  { %2353 = vmatprep.subr.bf16.mxu0 %v4004_v34  ;;  %2390 = vmatprep.subr.bf16.mxu1 %v4007_v35  ;;  %v4080_v34 = vld [vmem:[#allocation9 + $0x20] ss:$8 sps:$4 sm:$0xff]   ;;  %v4085_v35 = vld [vmem:[#allocation9 + $0x34] ss:$8 sps:$4 sm:$0xff]  }
 0x1eb   :  { %2354 = vmatpush1.bf16.msra.mxu0 %v4002_v17  ;;  %2391 = vmatpush1.bf16.msra.mxu1 %v4005_v36  ;;  %v4083_v17 = vld [vmem:[#allocation9 + $0x30] ss:$8 sps:$4 sm:$0xff]   ;;  %v4088_v36 = vld [vmem:[#allocation9 + $0x44] ss:$8 sps:$4 sm:$0xff]  }
 0x1ec   :  { %2355 = vmatprep.subr.bf16.mxu0 %v4010_v38  ;;  %2392 = vmatprep.subr.bf16.mxu1 %v4013_v54  ;;  %v4091_v38 = vld [vmem:[#allocation9 + $0x54] ss:$8 sps:$4 sm:$0xff]   ;;  %v4089_v54 = vld [vmem:[#allocation9 + $0x50] ss:$8 sps:$4 sm:$0xff]  }
 0x1ef   :  { %2356 = vmatpush1.bf16.msra.mxu0 %v4008_v39  ;;  %2393 = vmatpush1.bf16.msra.mxu1 %v4011_v40  ;;  %v4094_v39 = vld [vmem:[#allocation9 + $0x64] ss:$8 sps:$4 sm:$0xff]  }
 0x1f0   :  { %2357 = vmatprep.subr.bf16.mxu0 %v4016_v41  ;;  %2394 = vmatprep.subr.bf16.mxu1 %v4019_v42 }
 0x1f3   :  { %2358 = vmatpush1.bf16.msra.mxu0 %v4014_v43  ;;  %2395 = vmatpush1.bf16.msra.mxu1 %v4017_v48 }
 0x1f4   :  { %2359 = vmatprep.subr.bf16.mxu0 %v4022_v49  ;;  %2396 = vmatprep.subr.bf16.mxu1 %v4025_v50  ;;  %v4097_v50 = vld [vmem:[#allocation9 + $0x74] ss:$8 sps:$4 sm:$0xff]  }
 0x1f7   :  { %2360 = vmatpush1.bf16.msra.mxu0 %v4020_v51  ;;  %2397 = vmatpush1.bf16.msra.mxu1 %v4023_v52  ;;  %v4095_v51 = vld [vmem:[#allocation9 + $0x70] ss:$8 sps:$4 sm:$0xff]   ;;  %v4100_v52 = vld [vmem:[#allocation9 + $0x84] ss:$8 sps:$4 sm:$0xff]  }
 0x1f8   :  { %2361 = vmatprep.subr.bf16.mxu0 %v4028_v20  ;;  %2398 = vmatprep.subr.bf16.mxu1 %v4031_v55 }
 0x1fb   :  { %2362 = vmatpush1.bf16.msra.mxu0 %v4026_v60  ;;  %2399 = vmatpush1.bf16.msra.mxu1 %v4029_v62 }
 0x1fc   :  { %2363 = vmatprep.subr.bf16.mxu0 %v4034_v63  ;;  %2400 = vmatprep.subr.bf16.mxu1 %v4037_v2 }
 0x1ff   :  { %2364 = vmatpush1.bf16.msra.mxu0 %v4032_v46  ;;  %2401 = vmatpush1.bf16.msra.mxu1 %v4035_v3  ;;  %v4101_v46 = vld [vmem:[#allocation9 + $0x90] ss:$8 sps:$4 sm:$0xff]   ;;  %v4106_v3 = vld [vmem:[#allocation9 + $0xa4] ss:$8 sps:$4 sm:$0xff]  }
 0x200   :  { %2365 = vmatprep.subr.bf16.mxu0 %v4040_v4  ;;  %2402 = vmatprep.subr.bf16.mxu1 %v4043_v5  ;;  %v4104_v4 = vld [vmem:[#allocation9 + $0xa0] ss:$8 sps:$4 sm:$0xff]   ;;  %v4109_v5 = vld [vmem:[#allocation9 + $0xb4] ss:$8 sps:$4 sm:$0xff]  }
 0x203   :  { %2366 = vmatpush1.bf16.msra.mxu0 %v4038_v6  ;;  %2403 = vmatpush1.bf16.msra.mxu1 %v4041_v37  ;;  %v4107_v6 = vld [vmem:[#allocation9 + $0xb0] ss:$8 sps:$4 sm:$0xff]   ;;  %v4112_v37 = vld [vmem:[#allocation9 + $0xc4] ss:$8 sps:$4 sm:$0xff]  }
 0x204   :  { %2367 = vmatprep.subr.bf16.mxu0 %v4046_v8  ;;  %2404 = vmatprep.subr.bf16.mxu1 %v4049_v10  ;;  %v4110_v8 = vld [vmem:[#allocation9 + $0xc0] ss:$8 sps:$4 sm:$0xff]   ;;  %v4115_v10 = vld [vmem:[#allocation9 + $0xd4] ss:$8 sps:$4 sm:$0xff]  }
 0x207   :  { %2368 = vmatpush1.bf16.msra.mxu0 %v4044_v11  ;;  %2405 = vmatpush1.bf16.msra.mxu1 %v4047_v12  ;;  %v4113_v11 = vld [vmem:[#allocation9 + $0xd0] ss:$8 sps:$4 sm:$0xff]   ;;  %v4118_v12 = vld [vmem:[#allocation9 + $0xe4] ss:$8 sps:$4 sm:$0xff]  }
 0x208   :  { %2369 = vmatprep.subr.bf16.mxu0 %v4052_v14  ;;  %2406 = vmatprep.subr.bf16.mxu1 %v4055_v61  ;;  %v4116_v14 = vld [vmem:[#allocation9 + $0xe0] ss:$8 sps:$4 sm:$0xff]   ;;  %v4121_v61 = vld [vmem:[#allocation9 + $0xf4] ss:$8 sps:$4 sm:$0xff]  }
 0x20b   :  { %2370 = vmatpush1.bf16.msra.mxu0 %v4050_v15  ;;  %2407 = vmatpush1.bf16.msra.mxu1 %v4053_v16  ;;  %v4119_v15 = vld [vmem:[#allocation9 + $0xf0] ss:$8 sps:$4 sm:$0xff]   ;;  %v4124_v16 = vld [vmem:[#allocation9 + $0x104] ss:$8 sps:$4 sm:$0xff]  }
 0x20c   :  { %2371 = vmatprep.subr.bf16.mxu0 %v4058_v18  ;;  %2408 = vmatprep.subr.bf16.mxu1 %v4061_v19 }
 0x20f   :  { %2372 = vmatpush1.bf16.msra.mxu0 %v4056_v21  ;;  %2409 = vmatpush1.bf16.msra.mxu1 %v4059_v22 }
 0x210   :  { %2373 = vmatprep.subr.bf16.mxu0 %v4064_v23  ;;  %2410 = vmatprep.subr.bf16.mxu1 %v4067_v24 }
 0x213   :  { %2374 = vmatpush1.bf16.msra.mxu0 %v4062_v25  ;;  %2411 = vmatpush1.bf16.msra.mxu1 %v4065_v13  ;;  %v4604_v25 = vld [vmem:[%s4662_s6] sm:$0xf] }
 0x214   :  { %2412 = vmatprep.subr.bf16.mxu1 %v4070_v26  ;;  %2855 = vmatprep.subr.bf16.mxu0 %v4076_v27  ;;  %v2430_v13 = vrot.slane %v4604_v25, %v4526_v45  ;;  %v2434_v27 = vrot.slane %v4604_v25, %v4531_v47 }
 0x216   :  { %2376 = vmatmul.mubr.bf16.vlgmr.msra.gmra.mrb[12].mxu0 %v4584_v57  ;;  %v4086_v57 = vld [vmem:[#allocation9 + $0x40] ss:$8 sps:$4 sm:$0xff]  }
 0x217   :  { %2413 = vmatpush1.bf16.msra.mxu1 %v4068_v28  ;;  %2856 = vmatpush1.bf16.msra.mxu0 %v4074_v1 }
 0x218   :  { %2414 = vmatprep.subr.bf16.mxu1 %v4073_v29  ;;  %2857 = vmatprep.subr.bf16.mxu0 %v4079_v33 }
 0x21b   :  { %2415 = vmatpush1.bf16.msra.mxu1 %v4071_v30  ;;  %2858 = vmatpush1.bf16.msra.mxu0 %v4077_v31 }
 0x21c   :  { %2859 = vmatprep.subr.bf16.mxu0 %v4082_v32 }
 0x21e   :  { %2417 = vmatmul.mubr.bf16.vlgmr.msra.gmra.mrb[36].mxu1 %v4589_v7  ;;  %v4092_v7 = vld [vmem:[#allocation9 + $0x60] ss:$8 sps:$4 sm:$0xff]  }
 0x21f   :  { %2860 = vmatpush1.bf16.msra.mxu0 %v4080_v34 }
 0x220   :  { %2861 = vmatprep.subr.bf16.mxu0 %v4085_v35 }
 0x223   :  { %2862 = vmatpush1.bf16.msra.mxu0 %v4083_v17 }
 0x224   :  { %2863 = vmatprep.subr.bf16.mxu0 %v4088_v36  ;;  %v4122_v36 = vld [vmem:[#allocation9 + $0x100] ss:$8 sps:$4 sm:$0xff]  }
 0x227   :  { %2864 = vmatpush1.bf16.msra.mxu0 %v4086_v57 }
 0x228   :  { %2865 = vmatprep.subr.bf16.mxu0 %v4091_v38  ;;  %v4127_v38 = vld [vmem:[#allocation9 + $0x114] ss:$8 sps:$4 sm:$0xff]  }
 0x229   :  { %v2131_v40 = vpop.f32.mrb[0].mxu0 }
 0x22a   :  { %v2132_v41 = vadd.f32 %v2131_v40, %v4571_v58  ;;  %v2133_v42 = vpop.f32.mrb[1].mxu0  ;;  %v4098_v58 = vld [vmem:[#allocation9 + $0x80] ss:$8 sps:$4 sm:$0xff]  }
 0x22b   :  { %v2134_v43 = vadd.f32 %v2133_v42, %v4573_v59  ;;  %v2135_v48 = vpop.f32.mrb[2].mxu0  ;;  %2866 = vmatpush1.bf16.msra.mxu0 %v4089_v54  ;;  %v4103_v59 = vld [vmem:[#allocation9 + $0x94] ss:$8 sps:$4 sm:$0xff]   ;;  %v4170_v54 = vld [vmem:[#allocation10 + $0x40] sm:$0xff]   ;;  %v4172_v40 = vld [vmem:[#allocation10 + $0x48] sm:$0xff]  }
 0x22c   :  { %v2136_v49 = vpop.f32.mrb[3].mxu0  ;;  %2867 = vmatprep.subr.bf16.mxu0 %v4094_v39  ;;  %v4171_v39 = vld [vmem:[#allocation10] sm:$0xff]   ;;  %3610 = vmatprep.subr.bf16.mxu1 %v4170_v54  ;;  %v4174_v48 = vld [vmem:[#allocation10 + $0x50] sm:$0xff]  }
 0x22d   :  { %v4130_v42 = vld [vmem:[#allocation9 + $0x124] ss:$8 sps:$4 sm:$0xff]   ;;  %3611 = vmatpush3.bf16.msra.mxu1 %v4171_v39  ;;  %v4133_v49 = vld [vmem:[#allocation9 + $0x134] ss:$8 sps:$4 sm:$0xff]   ;;  %v2438_v39 = vrot.slane %v4604_v25, %v157_v53 }
 0x22e   :  { %3612 = vmatprep.subr.bf16.mxu1 %v4172_v40  ;;  %v4183_v53 = vld [vmem:[#allocation10 + $0x30] sm:$0xff]  }
 0x22f   :  { %2868 = vmatpush1.bf16.msra.mxu0 %v4092_v7  ;;  %v4128_v7 = vld [vmem:[#allocation9 + $0x120] ss:$8 sps:$4 sm:$0xff]  }
 0x230   :  { %2869 = vmatprep.subr.bf16.mxu0 %v4097_v50  ;;  %v4175_v50 = vld [vmem:[#allocation10 + $0x10] sm:$0xff]  }
 0x231   :  { %v2172_v20 = vpop.f32.mrb[24].mxu1 }
 0x232   :  { %v2173_v55 = vadd.f32 %v2172_v20, %v2132_v41  ;;  %v2174_v60 = vpop.f32.mrb[25].mxu1  ;;  %v4125_v41 = vld [vmem:[#allocation9 + $0x110] ss:$8 sps:$4 sm:$0xff]   ;;  %v4136_v20 = vld [vmem:[#allocation9 + $0x144] ss:$8 sps:$4 sm:$0xff]  }
 0x233   :  { %v2175_v62 = vadd.f32 %v2174_v60, %v2134_v43  ;;  %v2176_v63 = vpop.f32.mrb[26].mxu1  ;;  %2870 = vmatpush1.bf16.msra.mxu0 %v4095_v51  ;;  %v4173_v43 = vld [vmem:[#allocation10 + $0x8] sm:$0xff]   ;;  %v4176_v51 = vld [vmem:[#allocation10 + $0x58] sm:$0xff]   ;;  %v4178_v60 = vld [vmem:[#allocation10 + $0x60] sm:$0xff]  }
 0x234   :  { %v2177_v2 = vpop.f32.mrb[27].mxu1  ;;  %2871 = vmatprep.subr.bf16.mxu0 %v4100_v52  ;;  %3613 = vmatpush3.bf16.msra.mxu1 %v4173_v43  ;;  %v4131_v52 = vld [vmem:[#allocation9 + $0x130] ss:$8 sps:$4 sm:$0xff]   ;;  %v4139_v63 = vld [vmem:[#allocation9 + $0x154] ss:$8 sps:$4 sm:$0xff]  }
 0x235   :  { %3614 = vmatprep.subr.bf16.mxu1 %v4174_v48  ;;  %v4180_v2 = vld [vmem:[#allocation10 + $0x68] sm:$0xff]  }
 0x237   :  { %2872 = vmatpush1.bf16.msra.mxu0 %v4098_v58  ;;  %v4179_v58 = vld [vmem:[#allocation10 + $0x20] sm:$0xff]  }
 0x238   :  { %2873 = vmatprep.subr.bf16.mxu0 %v4103_v59  ;;  %3615 = vmatpush3.bf16.msra.mxu1 %v4175_v50  ;;  %v4137_v59 = vld [vmem:[#allocation9 + $0x150] ss:$8 sps:$4 sm:$0xff]  }
 0x239   :  { %3616 = vmatprep.subr.bf16.mxu1 %v4176_v51 }
 0x23b   :  { %2874 = vmatpush1.bf16.msra.mxu0 %v4101_v46  ;;  %v4142_v46 = vld [vmem:[#allocation9 + $0x164] ss:$8 sps:$4 sm:$0xff]  }
 0x23c   :  { %2875 = vmatprep.subr.bf16.mxu0 %v4106_v3  ;;  %v4181_v3 = vld [vmem:[#allocation10 + $0x28] sm:$0xff]  }
 0x23f   :  { %2876 = vmatpush1.bf16.msra.mxu0 %v4104_v4  ;;  %v4140_v4 = vld [vmem:[#allocation9 + $0x160] ss:$8 sps:$4 sm:$0xff]  }
 0x240   :  { %2877 = vmatprep.subr.bf16.mxu0 %v4109_v5  ;;  %v4145_v5 = vld [vmem:[#allocation9 + $0x174] ss:$8 sps:$4 sm:$0xff]  }
 0x243   :  { %2878 = vmatpush1.bf16.msra.mxu0 %v4107_v6  ;;  %v4143_v6 = vld [vmem:[#allocation9 + $0x170] ss:$8 sps:$4 sm:$0xff]  }
 0x244   :  { %2879 = vmatprep.subr.bf16.mxu0 %v4112_v37  ;;  %v4148_v37 = vld [vmem:[#allocation9 + $0x184] ss:$8 sps:$4 sm:$0xff]  }
 0x247   :  { %2880 = vmatpush1.bf16.msra.mxu0 %v4110_v8  ;;  %v4146_v8 = vld [vmem:[#allocation9 + $0x180] ss:$8 sps:$4 sm:$0xff]  }
 0x248   :  { %2881 = vmatprep.subr.bf16.mxu0 %v4115_v10  ;;  %v4151_v10 = vld [vmem:[#allocation9 + $0x194] ss:$8 sps:$4 sm:$0xff]  }
 0x24b   :  { %2882 = vmatpush1.bf16.msra.mxu0 %v4113_v11  ;;  %v4149_v11 = vld [vmem:[#allocation9 + $0x190] ss:$8 sps:$4 sm:$0xff]  }
 0x24c   :  { %2883 = vmatprep.subr.bf16.mxu0 %v4118_v12  ;;  %v4154_v12 = vld [vmem:[#allocation9 + $0x1a4] ss:$8 sps:$4 sm:$0xff]  }
 0x24f   :  { %2884 = vmatpush1.bf16.msra.mxu0 %v4116_v14  ;;  %v4152_v14 = vld [vmem:[#allocation9 + $0x1a0] ss:$8 sps:$4 sm:$0xff]  }
 0x250   :  { %2885 = vmatprep.subr.bf16.mxu0 %v4121_v61  ;;  %v4157_v61 = vld [vmem:[#allocation9 + $0x1b4] ss:$8 sps:$4 sm:$0xff]  }
 0x253   :  { %2886 = vmatpush1.bf16.msra.mxu0 %v4119_v15  ;;  %v4155_v15 = vld [vmem:[#allocation9 + $0x1b0] ss:$8 sps:$4 sm:$0xff]  }
 0x254   :  { %2896 = vmatprep.subr.bf16.mxu0 %v4124_v16  ;;  %v4160_v16 = vld [vmem:[#allocation9 + $0x1c4] ss:$8 sps:$4 sm:$0xff]  }
 0x269   :  { %v2213_v18 = vpop.f32.mrb[4].mxu0 }
 0x26a   :  { %v2214_v19 = vadd.f32 %v2213_v18, %v2173_v55  ;;  %v2215_v21 = vpop.f32.mrb[5].mxu0  ;;  %v4177_v55 = vld [vmem:[#allocation10 + $0x18] sm:$0xff]  }
 0x26b   :  { %v2216_v22 = vadd.f32 %v2215_v21, %v2175_v62  ;;  %v2217_v23 = vpop.f32.mrb[6].mxu0  ;;  %v4134_v62 = vld [vmem:[#allocation9 + $0x140] ss:$8 sps:$4 sm:$0xff]   ;;  %3617 = vmatpush3.bf16.msra.mxu1 %v4177_v55 }
 0x26c   :  { %v2218_v24 = vpop.f32.mrb[7].mxu0  ;;  %3618 = vmatprep.subr.bf16.mxu1 %v4178_v60  ;;  %v4163_v23 = vld [vmem:[#allocation9 + $0x1d4] ss:$8 sps:$4 sm:$0xff]  }
 0x26f   :  { %3619 = vmatpush3.bf16.msra.mxu1 %v4179_v58 }
 0x270   :  { %3620 = vmatprep.subr.bf16.mxu1 %v4180_v2 }
 0x271   :  { %v2254_v26 = vpop.f32.mrb[28].mxu1 }
 0x272   :  { %v2255_v28 = vadd.f32 %v2254_v26, %v2214_v19  ;;  %v2256_v1 = vpop.f32.mrb[29].mxu1  ;;  %v4158_v19 = vld [vmem:[#allocation9 + $0x1c0] ss:$8 sps:$4 sm:$0xff]  }
 0x273   :  { %v2257_v29 = vadd.f32 %v2256_v1, %v2216_v22  ;;  %v2258_v33 = vpop.f32.mrb[30].mxu1  ;;  %3621 = vmatpush3.bf16.msra.mxu1 %v4181_v3 }
 0x274   :  { %v2447_v30 = vadd.f32 %v2430_v13, %v2255_v28  ;;  %v2259_v31 = vpop.f32.mrb[31].mxu1  ;;  %v4166_v28 = vld [vmem:[#allocation9 + $0x1e4] ss:$8 sps:$4 sm:$0xff]  }
 0x275   :  { %v2448_v32 = vadd.f32 %v2434_v27, %v2257_v29  ;;  %v4161_v27 = vld [vmem:[#allocation9 + $0x1d0] ss:$8 sps:$4 sm:$0xff]   ;;  %v4164_v29 = vld [vmem:[#allocation9 + $0x1e0] ss:$8 sps:$4 sm:$0xff]   ;;  %v4169_v31 = vld [vmem:[#allocation9 + $0x1f4] ss:$8 sps:$4 sm:$0xff]  }
 0x276   :  { %v2451_v34 = vmax.f32 %v2447_v30, 0.0 }
 0x277   :  { %v2452_v35 = vmax.f32 %v2448_v32, 0.0 }
 0x278   :  { %v2455_v57 = vpack.c.bf16 %v2451_v34, %v2451_v34 }
 0x279   :  { %v2456_v17 = vpack.c.bf16 %v2452_v35, %v2452_v35  ;;  %v4167_v35 = vld [vmem:[#allocation9 + $0x1f0] ss:$8 sps:$4 sm:$0xff]  }
 0x27b   :  { %2887 = vmatprep.mubr.bf16.mxu0 %v2456_v17 }
 0x27c   :  { %2888 = vmatmul.mubr.bf16.vlgmr.msra.gmra.mrb[16].mxu0 %v2455_v57 }
 0x27d   :  { %2897 = vmatpush1.bf16.msra.mxu0 %v4122_v36 }
 0x27e   :  { %2898 = vmatprep.subr.bf16.mxu0 %v4127_v38 }
 0x281   :  { %2899 = vmatpush1.bf16.msra.mxu0 %v4125_v41  ;;  %v2442_v41 = vrot.slane %v4604_v25, %v161_v56  ;;  %v4349_v56 = vmov 0.0   ;;  %v2523_v25 = vld [vmem:[%s4664_s8] sm:$0x3] }
 0x282   :  { %2900 = vmatprep.subr.bf16.mxu0 %v4130_v42  ;;  %v2528_v58 = vrot.slane %v2523_v25, %v4526_v45  ;;  %v2532_v2 = vrot.slane %v2523_v25, %v4531_v47  ;;  %v4187_v45 = vld [vmem:[%s4667_s11 + $0x8] sm:$0xff]   ;;  %v4188_v47 = vld [vmem:[%s4667_s11 + $0x10] sm:$0xff]  }
 0x285   :  { %2901 = vmatpush1.bf16.msra.mxu0 %v4128_v7 }
 0x286   :  { %2902 = vmatprep.subr.bf16.mxu0 %v4133_v49 }
 0x289   :  { %2903 = vmatpush1.bf16.msra.mxu0 %v4131_v52 }
 0x28a   :  { %2904 = vmatprep.subr.bf16.mxu0 %v4136_v20 }
 0x28d   :  { %2905 = vmatpush1.bf16.msra.mxu0 %v4134_v62  ;;  %v4182_v62 = vld [vmem:[#allocation10 + $0x70] sm:$0xff]  }
 0x28e   :  { %2906 = vmatprep.subr.bf16.mxu0 %v4139_v63  ;;  %3622 = vmatprep.subr.bf16.mxu1 %v4182_v62  ;;  %v4185_v63 = vld [vmem:[#allocation10 + $0x38] sm:$0xff]  }
 0x28f   :  { %3623 = vmatpush3.bf16.msra.mxu1 %v4183_v53 }
 0x290   :  { %3624 = vmatprep.subr.bf16.mxu1 %v4184_v44 }
 0x291   :  { %2907 = vmatpush1.bf16.msra.mxu0 %v4137_v59 }
 0x292   :  { %2908 = vmatprep.subr.bf16.mxu0 %v4142_v46 }
 0x293   :  { %3625 = vmatpush3.bf16.msra.mxu1 %v4185_v63 }
 0x294   :  { %3641 = vmatprep.subr.bf16.mxu1 %v4349_v56 }
 0x295   :  { %2909 = vmatpush1.bf16.msra.mxu0 %v4140_v4 }
 0x296   :  { %2910 = vmatprep.subr.bf16.mxu0 %v4145_v5 }
 0x299   :  { %2911 = vmatpush1.bf16.msra.mxu0 %v4143_v6 }
 0x29a   :  { %2912 = vmatprep.subr.bf16.mxu0 %v4148_v37 }
 0x29d   :  { %2913 = vmatpush1.bf16.msra.mxu0 %v4146_v8 }
 0x29e   :  { %2914 = vmatprep.subr.bf16.mxu0 %v4151_v10 }
 0x2a1   :  { %2915 = vmatpush1.bf16.msra.mxu0 %v4149_v11  ;;  %v4186_v11 = vld [vmem:[%s4667_s11] sm:$0xff]  }
 0x2a2   :  { %2916 = vmatprep.subr.bf16.mxu0 %v4154_v12 }
 0x2a5   :  { %2917 = vmatpush1.bf16.msra.mxu0 %v4152_v14  ;;  %v4189_v14 = vld [vmem:[%s4667_s11 + $0x18] sm:$0xff]  }
 0x2a6   :  { %2918 = vmatprep.subr.bf16.mxu0 %v4157_v61  ;;  %v4190_v61 = vld [vmem:[%s4667_s11 + $0x20] sm:$0xff]  }
 0x2a9   :  { %v2295_v18 = vpop.f32.mrb[8].mxu0  ;;  %2919 = vmatpush1.bf16.msra.mxu0 %v4155_v15  ;;  %v4191_v15 = vld [vmem:[%s4667_s11 + $0x28] sm:$0xff]  }
 0x2aa   :  { %v2296_v21 = vadd.f32 %v2295_v18, %v4575_v0  ;;  %v2297_v22 = vpop.f32.mrb[9].mxu0  ;;  %2920 = vmatprep.subr.bf16.mxu0 %v4160_v16  ;;  %v4192_v16 = vld [vmem:[%s4667_s11 + $0x30] sm:$0xff]   ;;  %v4193_v18 = vld [vmem:[%s4667_s11 + $0x38] sm:$0xff]  }
 0x2ab   :  { %v2298_v24 = vadd.f32 %v2297_v22, %v4577_v9  ;;  %v2299_v13 = vpop.f32.mrb[10].mxu0 }
 0x2ac   :  { %v2300_v26 = vpop.f32.mrb[11].mxu0 }
 0x2ad   :  { %2921 = vmatpush1.bf16.msra.mxu0 %v4158_v19 }
 0x2ae   :  { %2922 = vmatprep.subr.bf16.mxu0 %v4163_v23 }
 0x2b1   :  { %v2336_v1 = vpop.f32.mrb[32].mxu1  ;;  %2923 = vmatpush1.bf16.msra.mxu0 %v4161_v27 }
 0x2b2   :  { %v2337_v33 = vadd.f32 %v2336_v1, %v2296_v21  ;;  %v2338_v30 = vpop.f32.mrb[33].mxu1  ;;  %2924 = vmatprep.subr.bf16.mxu0 %v4166_v28  ;;  %v3584_v21 = vld [vmem:[%s4666_s10] ss:$0 sm:$0xff] }
 0x2b3   :  { %v2339_v32 = vadd.f32 %v2338_v30, %v2298_v24  ;;  %v2340_v0 = vpop.f32.mrb[34].mxu1  ;;  %v3601_v1 = vld [vmem:[%s4668_s12] ss:$0 sm:$0xff] }
 0x2b4   :  { %v2341_v34 = vpop.f32.mrb[35].mxu1 }
 0x2b5   :  { %2925 = vmatpush1.bf16.msra.mxu0 %v4164_v29 }
 0x2b6   :  { %2926 = vmatprep.subr.bf16.mxu0 %v4169_v31 }
 0x2b9   :  { %2927 = vmatpush1.bf16.msra.mxu0 %v4167_v35 }
 0x2e9   :  { %v2377_v9 = vpop.f32.mrb[12].mxu0 }
 0x2ea   :  { %v2378_v17 = vadd.f32 %v2377_v9, %v2337_v33  ;;  %v2379_v36 = vpop.f32.mrb[13].mxu0 }
 0x2eb   :  { %v2380_v57 = vadd.f32 %v2379_v36, %v2339_v32  ;;  %v2381_v38 = vpop.f32.mrb[14].mxu0 }
 0x2ec   :  { %v2382_v54 = vpop.f32.mrb[15].mxu0 }
 0x2f1   :  { %v2418_v40 = vpop.f32.mrb[36].mxu1 }
 0x2f2   :  { %v2419_v42 = vadd.f32 %v2418_v40, %v2378_v17  ;;  %v2420_v43 = vpop.f32.mrb[37].mxu1 }
 0x2f3   :  { %v2421_v48 = vadd.f32 %v2420_v43, %v2380_v57  ;;  %v2422_v7 = vpop.f32.mrb[38].mxu1 }
 0x2f4   :  { %v2449_v49 = vadd.f32 %v2438_v39, %v2419_v42  ;;  %v2423_v50 = vpop.f32.mrb[39].mxu1 }
 0x2f5   :  { %v2450_v51 = vadd.f32 %v2442_v41, %v2421_v48 }
 0x2f6   :  { %v2453_v52 = vmax.f32 %v2449_v49, 0.0 }
 0x2f7   :  { %v2454_v20 = vmax.f32 %v2450_v51, 0.0 }
 0x2f8   :  { %v2457_v60 = vpack.c.bf16 %v2453_v52, %v2453_v52 }
 0x2f9   :  { %v2458_v55 = vpack.c.bf16 %v2454_v20, %v2454_v20 }
 0x2fb   :  { %2928 = vmatprep.mubr.bf16.mxu0 %v2458_v55 }
 0x2fc   :  { %2929 = vmatmul.mubr.bf16.vlgmr.msra.gmra.mrb[16].mxu0 %v2457_v60 }
 0x3cf   :  { %v2930_v59 = vpop.f32.mrb[16].mxu0 }
 0x3d0   :  { %v3661_v46 = vadd.f32 %v2930_v59, %v2528_v58  ;;  %v2932_v3 = vpop.f32.mrb[17].mxu0 }
 0x3d1   :  { %v3662_v4 = vadd.f32 %v2932_v3, %v2532_v2  ;;  %v2934_v5 = vpop.f32.mrb[18].mxu0 }
 0x3d2   :  { %v2937_v6 = vmax.f32 %v3661_v46, 0.0  ;;  %v2935_v37 = vpop.f32.mrb[19].mxu0 }
 0x3d3   :  { %v2938_v8 = vmax.f32 %v3662_v4, 0.0 }
 0x3d4   :  { %v2939_v12 = vpack.c.bf16 %v2937_v6, %v2937_v6 }
 0x3d5   :  { %v2940_v10 = vpack.c.bf16 %v2938_v8, %v2938_v8 }
 0x3d7   :  { %3108 = vmatprep.mubr.bf16.mxu1 %v2940_v10 }
 0x3d8   :  { %3109 = vmatmul.mubr.bf16.vlgmr.msra.gmra.mrb[40].mxu1 %v2939_v12 }
 0x3d9   :  { %3642 = vmatpush3.bf16.msra.mxu1 %v4186_v11  ;;  %3657 = vmatprep.mubr.msk.bf16.mxu1 %vm4350_vm2, %v4349_v56 }
 0x3da   :  { %3643 = vmatprep.subr.bf16.mxu1 %v4349_v56 }
 0x3dd   :  { %3644 = vmatpush3.bf16.msra.mxu1 %v4187_v45 }
 0x3de   :  { %3645 = vmatprep.subr.bf16.mxu1 %v4349_v56 }
 0x3e1   :  { %3646 = vmatpush3.bf16.msra.mxu1 %v4188_v47 }
 0x3e2   :  { %3647 = vmatprep.subr.bf16.mxu1 %v4349_v56 }
 0x3e5   :  { %3648 = vmatpush3.bf16.msra.mxu1 %v4189_v14 }
 0x3e6   :  { %3649 = vmatprep.subr.bf16.mxu1 %v4349_v56 }
 0x3e9   :  { %3650 = vmatpush3.bf16.msra.mxu1 %v4190_v61 }
 0x3ea   :  { %3651 = vmatprep.subr.bf16.mxu1 %v4349_v56 }
 0x3ed   :  { %3652 = vmatpush3.bf16.msra.mxu1 %v4191_v15 }
 0x3ee   :  { %3653 = vmatprep.subr.bf16.mxu1 %v4349_v56 }
 0x3f1   :  { %3654 = vmatpush3.bf16.msra.mxu1 %v4192_v16 }
 0x3f2   :  { %3655 = vmatprep.subr.bf16.mxu1 %v4349_v56 }
 0x3f5   :  { %3656 = vmatpush3.bf16.msra.mxu1 %v4193_v18 }
 0x4ab   :  { %v3626_v19 = vpop.f32.mrb[40].mxu1 }
 0x4ac   :  { %v3627_v22 = vpop.f32.mrb[41].mxu1 }
 0x4ad   :  { %v3628_v23 = vadd.f32 %v3627_v22, %v3626_v19  ;;  %v3629_v24 = vpop.f32.mrb[42].mxu1 }
 0x4ae   :  { %v3630_v13 = vpop.f32.mrb[43].mxu1 }
 0x4af   :  { %v3111_v26 = vadd.f32 %v3628_v23, %v3584_v21 }
 0x4b1   :  { %v3116_v27 = vmax.f32 %v3111_v26, 0.0 }
 0x4b3   :  { %v3117_v28 = vpack.c.bf16 %v3116_v27, %v3116_v27 }
 0x4b5   :  { %3658 = vmatmul.mubr.bf16.vlgmr.msra.gmra.mrb[44].mxu1 %v3117_v28 }
 0x588   :  { %v3223_v29 = vpop.f32.mrb[44].mxu1 }
 0x589   :  { %v3224_v33 = vadd.f32 %v3601_v1, %v3223_v29  ;;  %v3659_v30 = vpop.f32.mrb[45].mxu1 }
 0x58a   :  { %v3226_v31 = vpop.f32.mrb[46].mxu1 }
 0x58b   :  { %3229 = vst [vmem:[%s4669_s13] sm:$0xff] %v3224_v33  ;;  %v3660_v32 = vpop.f32.mrb[47].mxu1 }
 0x58c   :  { %3234 = vsyncpa [#allocation3], 1 }
 0x58d   :  { %3235 = vsyncpa [#allocation5], 1 }
 0x58e   :  { %3236 = vsyncpa [#allocation8], 1 }
 0x58f   :  { %3237 = vsyncpa [#allocation11], 1 }

</bundles_post_ra>
